<compile_context>
chip_gen: v7x
topology: tpu7x:2x2x1
jax: 0.10.0
libtpu: 0.0.40
codegen_flags: <defaults>
</compile_context>

<pallas_src>
import functools
import math

import jax
import jax.numpy as jnp
from jax import lax
from jax.experimental import pallas as pl
from jax.experimental.pallas import tpu as pltpu


# ------------------------------ Model config --------------------------------

class Config:
    vocab_size = 128
    max_position = 32
    hidden = 128
    heads = 4
    layers = 2
    intermediate = 256
    n_classes = 3
    ln_eps = 1e-12
    lane = 128           # TPU lane width; classifier output padded to this


# --------------------------- Fused forward kernel ---------------------------

def _gelu(x):
    # tanh-approx GELU (BERT intermediate activation)
    c = math.sqrt(2.0 / math.pi)
    return 0.5 * x * (1.0 + jnp.tanh(c * (x + 0.044715 * x * x * x)))


def _layernorm(x, g, b, eps):
    mean = jnp.mean(x, axis=-1, keepdims=True)
    var = jnp.mean(jnp.square(x - mean), axis=-1, keepdims=True)
    return (x - mean) * lax.rsqrt(var + eps) * g + b


def _fused_forward_kernel(
    # per-sequence blocked inputs
    emb_ref, mask_ref,
    # VMEM-resident weights (constant index_maps)
    eg_ref, eb_ref,
    wqkv_ref, bqkv_ref, wo_ref, bo_ref, ln1g_ref, ln1b_ref,
    wi_ref, bi_ref, wf_ref, bf_ref, ln2g_ref, ln2b_ref,
    pw_ref, pb_ref, ow_ref, ob_ref,
    # output
    out_ref,
    *, S, nH, Dh, n_layers, eps,
):
    H = nH * Dh

    # --- embedding LayerNorm (one sequence: (S, H)) ---
    x = _layernorm(emb_ref[0], eg_ref[...], eb_ref[...], eps)

    # Layer-invariant additive mask, broadcast ONCE (not per head / per layer).
    m_bcast = jnp.broadcast_to(mask_ref[0], (S, S))                # (S, S)

    for layer in range(n_layers):
        # --- fused QKV projection: bf16 operands, f32 accumulate.
        #     1/sqrt(Dh) is already folded into the Q columns at pack time. ---
        xb = x.astype(jnp.bfloat16)
        qkv = (jnp.dot(xb, wqkv_ref[layer], preferred_element_type=jnp.float32)
               + bqkv_ref[layer])
        q = qkv[:, 0:H]
        k = qkv[:, H:2 * H]
        v = qkv[:, 2 * H:3 * H]

        # --- attention: heads are static column slices; per-head outputs stay
        #     register-resident and are concatenated lane-dense (no scratch). ---
        heads = []
        for h in range(nH):
            c0 = h * Dh
            q_h = q[:, c0:c0 + Dh]                                 # (S, Dh)
            k_h = k[:, c0:c0 + Dh]
            v_h = v[:, c0:c0 + Dh]
            # contraction on axis 1 of both operands: no explicit k_h.T
            s = lax.dot_general(q_h, k_h, (((1,), (1,)), ((), ())),
                                preferred_element_type=jnp.float32)
            s = s + m_bcast
            s = s - jnp.max(s, axis=-1, keepdims=True)
            p = jnp.exp(s)
            p = p * pl.reciprocal(jnp.sum(p, axis=-1, keepdims=True),
                                  approx=True)                    # EUP, ~free
            heads.append(jnp.dot(p, v_h, preferred_element_type=jnp.float32))
        ctx = jnp.concatenate(heads, axis=-1)                      # (S, H)

        # --- attention output projection + bias + residual + LayerNorm ---
        attn = (jnp.dot(ctx.astype(jnp.bfloat16), wo_ref[layer],
                        preferred_element_type=jnp.float32) + bo_ref[layer])
        x = _layernorm(attn + x, ln1g_ref[layer], ln1b_ref[layer], eps)

        # --- FFN up-proj + GELU + down-proj + bias + residual + LayerNorm ---
        hmid = (jnp.dot(x.astype(jnp.bfloat16), wi_ref[layer],
                        preferred_element_type=jnp.float32) + bi_ref[layer])
        hmid = _gelu(hmid)
        ffn = (jnp.dot(hmid.astype(jnp.bfloat16), wf_ref[layer],
                       preferred_element_type=jnp.float32) + bf_ref[layer])
        x = _layernorm(ffn + x, ln2g_ref[layer], ln2b_ref[layer], eps)

    # --- BERT pooler (tanh) + classifier head.  Computed for all S rows so the
    #     store is a lane-dense full block; wrapper selects the CLS row and the
    #     first n_classes lanes.  (S-times redundant MXU work is noise here.) ---
    pooled = jnp.tanh(jnp.dot(x.astype(jnp.bfloat16), pw_ref[...],
                              preferred_element_type=jnp.float32) + pb_ref[...])
    logits = (jnp.dot(pooled.astype(jnp.bfloat16), ow_ref[...],
                      preferred_element_type=jnp.float32) + ob_ref[...])
    out_ref[0] = logits.astype(out_ref.dtype)


# ------------------------------ Param handling -------------------------------

def init_params(key, cfg):
    def normal(k, shape):
        return (0.02 * jax.random.normal(k, shape)).astype(jnp.float32)

    keys = iter(jax.random.split(key, 64))
    p = {
        "word_emb": normal(next(keys), (cfg.vocab_size, cfg.hidden)),
        "pos_emb": normal(next(keys), (cfg.max_position, cfg.hidden)),
        "type_emb": normal(next(keys), (2, cfg.hidden)),
        "emb_ln_g": jnp.ones((cfg.hidden,), jnp.float32),
        "emb_ln_b": jnp.zeros((cfg.hidden,), jnp.float32),
        "layers": [],
        "pooler_w": normal(next(keys), (cfg.hidden, cfg.hidden)),
        "pooler_b": jnp.zeros((cfg.hidden,), jnp.float32),
        "out_w": normal(next(keys), (cfg.hidden, cfg.n_classes)),
        "out_b": jnp.zeros((cfg.n_classes,), jnp.float32),
    }
    for _ in range(cfg.layers):
        lp = {
            "wq": normal(next(keys), (cfg.hidden, cfg.hidden)),
            "bq": jnp.zeros((cfg.hidden,), jnp.float32),
            "wk": normal(next(keys), (cfg.hidden, cfg.hidden)),
            "bk": jnp.zeros((cfg.hidden,), jnp.float32),
            "wv": normal(next(keys), (cfg.hidden, cfg.hidden)),
            "bv": jnp.zeros((cfg.hidden,), jnp.float32),
            "wo": normal(next(keys), (cfg.hidden, cfg.hidden)),
            "bo": jnp.zeros((cfg.hidden,), jnp.float32),
            "ln1_g": jnp.ones((cfg.hidden,), jnp.float32),
            "ln1_b": jnp.zeros((cfg.hidden,), jnp.float32),
            "wi": normal(next(keys), (cfg.hidden, cfg.intermediate)),
            "bi": jnp.zeros((cfg.intermediate,), jnp.float32),
            "wf": normal(next(keys), (cfg.intermediate, cfg.hidden)),
            "bf": jnp.zeros((cfg.hidden,), jnp.float32),
            "ln2_g": jnp.ones((cfg.hidden,), jnp.float32),
            "ln2_b": jnp.zeros((cfg.hidden,), jnp.float32),
        }
        p["layers"].append(lp)
    return p


def pack_params(params, cfg):
    """One-time repack: fuse QKV (with 1/sqrt(Dh) folded into Q), stack layers,
    cast matmul weights to bf16, lane-pad the classifier head."""
    H, N, lane = cfg.hidden, cfg.n_classes, cfg.lane
    Dh = H // cfg.heads
    scale = 1.0 / math.sqrt(Dh)
    layers = params["layers"]
    wdt = jnp.bfloat16   # MXU-native weight dtype; biases/LN stay f32

    def stack_mat(name):
        return jnp.stack([lp[name] for lp in layers]).astype(wdt)     # (L,in,out)

    def stack_vec(name):
        return jnp.stack([lp[name].reshape(1, -1) for lp in layers])  # (L,1,dim)

    wqkv = jnp.stack([jnp.concatenate([lp["wq"] * scale, lp["wk"], lp["wv"]], axis=1)
                      for lp in layers]).astype(wdt)                   # (L,H,3H)
    bqkv = jnp.stack([jnp.concatenate([lp["bq"] * scale, lp["bk"], lp["bv"]]).reshape(1, -1)
                      for lp in layers])                               # (L,1,3H) f32

    out_w_pad = (jnp.zeros((H, lane), jnp.float32)
                 .at[:, :N].set(params["out_w"]).astype(wdt))
    out_b_pad = jnp.zeros((1, lane), jnp.float32).at[0, :N].set(params["out_b"])

    return {
        "word_emb": params["word_emb"],
        "pos_emb": params["pos_emb"],
        "type_emb": params["type_emb"],
        "emb_ln_g": params["emb_ln_g"].reshape(1, H),
        "emb_ln_b": params["emb_ln_b"].reshape(1, H),
        "wqkv": wqkv, "bqkv": bqkv,
        "wo": stack_mat("wo"), "bo": stack_vec("bo"),
        "ln1_g": stack_vec("ln1_g"), "ln1_b": stack_vec("ln1_b"),
        "wi": stack_mat("wi"), "bi": stack_vec("bi"),
        "wf": stack_mat("wf"), "bf": stack_vec("bf"),
        "ln2_g": stack_vec("ln2_g"), "ln2_b": stack_vec("ln2_b"),
        "pooler_w": params["pooler_w"].astype(wdt),
        "pooler_b": params["pooler_b"].reshape(1, H),
        "out_w_pad": out_w_pad, "out_b_pad": out_b_pad,
    }


# ------------------------------ Forward pass ---------------------------------

def sentiment_classifier_forward(packed, input_ids, attention_mask, cfg):
    B, S = input_ids.shape
    H, nH = cfg.hidden, cfg.heads
    Dh = H // nH

    # Embedding gathers are XLA glue; everything else runs in the fused kernel.
    we = jnp.take(packed["word_emb"], input_ids, axis=0)            # (B, S, H)
    pe = packed["pos_emb"][:S][None, :, :]                          # (1, S, H)
    te = packed["type_emb"][0][None, None, :]                       # (1, 1, H)
    emb = (we + pe + te).astype(jnp.float32)                        # (B, S, H)

    # BERT additive mask, (B, 1, S); broadcast once inside the kernel.
    mask_add = ((1.0 - attention_mask.astype(jnp.float32)) * -1e4).reshape(B, 1, S)

    kernel = functools.partial(
        _fused_forward_kernel,
        S=S, nH=nH, Dh=Dh, n_layers=cfg.layers, eps=cfg.ln_eps)

    weight_args = (
        packed["emb_ln_g"], packed["emb_ln_b"],
        packed["wqkv"], packed["bqkv"],
        packed["wo"], packed["bo"], packed["ln1_g"], packed["ln1_b"],
        packed["wi"], packed["bi"], packed["wf"], packed["bf"],
        packed["ln2_g"], packed["ln2_b"],
        packed["pooler_w"], packed["pooler_b"],
        packed["out_w_pad"], packed["out_b_pad"],
    )

    def _resident_spec(arr):
        zeros = (0,) * arr.ndim
        return pl.BlockSpec(arr.shape, lambda i, zeros=zeros: zeros)

    in_specs = [
        pl.BlockSpec((1, S, H), lambda i: (i, 0, 0)),       # emb, per-sequence
        pl.BlockSpec((1, 1, S), lambda i: (i, 0, 0)),       # additive mask
    ] + [_resident_spec(w) for w in weight_args]

    out_pad = pl.pallas_call(
        kernel,
        out_shape=jax.ShapeDtypeStruct((B, S, cfg.lane), jnp.float32),
        grid_spec=pltpu.PrefetchScalarGridSpec(
            num_scalar_prefetch=0,
            grid=(B,),
            in_specs=in_specs,
            out_specs=pl.BlockSpec((1, S, cfg.lane), lambda i: (i, 0, 0)),
        ),
        compiler_params=pltpu.CompilerParams(
            dimension_semantics=("parallel",)),      # v7x: one sequence per TC
    )(emb, mask_add, *weight_args)

    # CLS token is row 0 of each sequence; real logits are the first n_classes lanes.
    logits = out_pad[:, 0, :cfg.n_classes]
    # nn.Dropout(p=0.3) is the identity at inference time.
    # TODO(synk): training-mode stochastic dropout masking not implemented.
    return logits


# --------------------------- Pure-JAX reference ------------------------------

def reference_forward(params, input_ids, attention_mask, cfg):
    B, S = input_ids.shape
    H, nH = cfg.hidden, cfg.heads
    Dh = H // nH

    def ln(v, g, b):
        m = v.mean(-1, keepdims=True)
        var = jnp.square(v - m).mean(-1, keepdims=True)
        return (v - m) * lax.rsqrt(var + cfg.ln_eps) * g + b

    we = jnp.take(params["word_emb"], input_ids, axis=0)
    pe = params["pos_emb"][:S][None]
    te = params["type_emb"][0][None, None]
    x = ln(we + pe + te, params["emb_ln_g"], params["emb_ln_b"])
    mask = (1.0 - attention_mask.astype(jnp.float32)) * -1e4

    for lp in params["layers"]:
        q = x @ lp["wq"] + lp["bq"]
        k = x @ lp["wk"] + lp["bk"]
        v = x @ lp["wv"] + lp["bv"]

        def sh(t):
            return t.reshape(B, S, nH, Dh).transpose(0, 2, 1, 3)

        s = jnp.einsum("bhqd,bhkd->bhqk", sh(q), sh(k)) / math.sqrt(Dh)
        s = s + mask[:, None, None, :]
        p = jax.nn.softmax(s, axis=-1)
        ctx = jnp.einsum("bhqk,bhkd->bhqd", p, sh(v)).transpose(0, 2, 1, 3)
        ctx = ctx.reshape(B, S, H)
        x = ln(ctx @ lp["wo"] + lp["bo"] + x, lp["ln1_g"], lp["ln1_b"])

        hmid = x @ lp["wi"] + lp["bi"]
        c = math.sqrt(2.0 / math.pi)
        hmid = 0.5 * hmid * (1.0 + jnp.tanh(c * (hmid + 0.044715 * hmid ** 3)))
        x = ln(hmid @ lp["wf"] + lp["bf"] + x, lp["ln2_g"], lp["ln2_b"])

    cls = x[:, 0, :]
    pooled = jnp.tanh(cls @ params["pooler_w"] + params["pooler_b"])
    return pooled @ params["out_w"] + params["out_b"]


# --------------------------------- Main --------------------------------------

if __name__ == "__main__":
    cfg = Config()
    key = jax.random.PRNGKey(0)
    k_params, k_ids = jax.random.split(key)

    params = init_params(k_params, cfg)
    packed = pack_params(params, cfg)

    B, S = 2, 8
    input_ids = jax.random.randint(k_ids, (B, S), 0, cfg.vocab_size, dtype=jnp.int32)
    # second sequence has the last 3 tokens padded out
    attention_mask = jnp.array(
        [[1, 1, 1, 1, 1, 1, 1, 1],
         [1, 1, 1, 1, 1, 0, 0, 0]], dtype=jnp.int32)

    @jax.jit
    def run(packed, ids, mask):
        return sentiment_classifier_forward(packed, ids, mask, cfg)

    logits = jax.block_until_ready(run(packed, input_ids, attention_mask))

    assert logits.shape == (B, cfg.n_classes)
    assert bool(jnp.all(jnp.isfinite(logits)))

    ref = reference_forward(params, input_ids, attention_mask, cfg)
    assert bool(jnp.max(jnp.abs(logits - ref)) < 2e-2)

    print("KERNEL_OK")
</pallas_src>

<mosaic_0001>
module attributes {stable_mosaic.version = 11 : i64} {
  func.func @_fused_forward_kernel(%arg0: i32, %arg1: memref<1x8x128xf32, #tpu.memory_space<vmem>>, %arg2: memref<1x1x8xf32, #tpu.memory_space<vmem>>, %arg3: memref<1x128xf32, #tpu.memory_space<vmem>>, %arg4: memref<1x128xf32, #tpu.memory_space<vmem>>, %arg5: memref<2x128x384xbf16, #tpu.memory_space<vmem>>, %arg6: memref<2x1x384xf32, #tpu.memory_space<vmem>>, %arg7: memref<2x128x128xbf16, #tpu.memory_space<vmem>>, %arg8: memref<2x1x128xf32, #tpu.memory_space<vmem>>, %arg9: memref<2x1x128xf32, #tpu.memory_space<vmem>>, %arg10: memref<2x1x128xf32, #tpu.memory_space<vmem>>, %arg11: memref<2x128x256xbf16, #tpu.memory_space<vmem>>, %arg12: memref<2x1x256xf32, #tpu.memory_space<vmem>>, %arg13: memref<2x256x128xbf16, #tpu.memory_space<vmem>>, %arg14: memref<2x1x128xf32, #tpu.memory_space<vmem>>, %arg15: memref<2x1x128xf32, #tpu.memory_space<vmem>>, %arg16: memref<2x1x128xf32, #tpu.memory_space<vmem>>, %arg17: memref<128x128xbf16, #tpu.memory_space<vmem>>, %arg18: memref<1x128xf32, #tpu.memory_space<vmem>>, %arg19: memref<128x128xbf16, #tpu.memory_space<vmem>>, %arg20: memref<1x128xf32, #tpu.memory_space<vmem>>, %arg21: memref<1x8x128xf32, #tpu.memory_space<vmem>>) attributes {dimension_semantics = [#tpu.dimension_semantics<parallel>], iteration_bounds = array<i64: 2>, scalar_prefetch = 0 : i64, scratch_operands = 0 : i64, tpu.core_type = #tpu.core_type<tc>, window_params = [{transform_indices = @transform_0, window_bounds = array<i64: 1, 8, 128>}, {transform_indices = @transform_1, window_bounds = array<i64: 1, 1, 8>}, {pipeline_mode = #tpu.pipeline_mode<synchronous>, transform_indices = @transform_2, window_bounds = array<i64: 1, 128>}, {pipeline_mode = #tpu.pipeline_mode<synchronous>, transform_indices = @transform_3, window_bounds = array<i64: 1, 128>}, {pipeline_mode = #tpu.pipeline_mode<synchronous>, transform_indices = @transform_4, window_bounds = array<i64: 2, 128, 384>}, {pipeline_mode = #tpu.pipeline_mode<synchronous>, transform_indices = @transform_5, window_bounds = array<i64: 2, 1, 384>}, {pipeline_mode = #tpu.pipeline_mode<synchronous>, transform_indices = @transform_6, window_bounds = array<i64: 2, 128, 128>}, {pipeline_mode = #tpu.pipeline_mode<synchronous>, transform_indices = @transform_7, window_bounds = array<i64: 2, 1, 128>}, {pipeline_mode = #tpu.pipeline_mode<synchronous>, transform_indices = @transform_8, window_bounds = array<i64: 2, 1, 128>}, {pipeline_mode = #tpu.pipeline_mode<synchronous>, transform_indices = @transform_9, window_bounds = array<i64: 2, 1, 128>}, {pipeline_mode = #tpu.pipeline_mode<synchronous>, transform_indices = @transform_10, window_bounds = array<i64: 2, 128, 256>}, {pipeline_mode = #tpu.pipeline_mode<synchronous>, transform_indices = @transform_11, window_bounds = array<i64: 2, 1, 256>}, {pipeline_mode = #tpu.pipeline_mode<synchronous>, transform_indices = @transform_12, window_bounds = array<i64: 2, 256, 128>}, {pipeline_mode = #tpu.pipeline_mode<synchronous>, transform_indices = @transform_13, window_bounds = array<i64: 2, 1, 128>}, {pipeline_mode = #tpu.pipeline_mode<synchronous>, transform_indices = @transform_14, window_bounds = array<i64: 2, 1, 128>}, {pipeline_mode = #tpu.pipeline_mode<synchronous>, transform_indices = @transform_15, window_bounds = array<i64: 2, 1, 128>}, {pipeline_mode = #tpu.pipeline_mode<synchronous>, transform_indices = @transform_16, window_bounds = array<i64: 128, 128>}, {pipeline_mode = #tpu.pipeline_mode<synchronous>, transform_indices = @transform_17, window_bounds = array<i64: 1, 128>}, {pipeline_mode = #tpu.pipeline_mode<synchronous>, transform_indices = @transform_18, window_bounds = array<i64: 128, 128>}, {pipeline_mode = #tpu.pipeline_mode<synchronous>, transform_indices = @transform_19, window_bounds = array<i64: 1, 128>}, {transform_indices = @transform_20, window_bounds = array<i64: 1, 8, 128>}]} {
    %c0 = arith.constant 0 : index
    %c0_0 = arith.constant 0 : index
    %c0_1 = arith.constant 0 : index
    %0 = vector.load %arg1[%c0, %c0_0, %c0_1] : memref<1x8x128xf32, #tpu.memory_space<vmem>>, vector<1x8x128xf32>
    %1 = vector.shape_cast %0 : vector<1x8x128xf32> to vector<8x128xf32>
    %c0_2 = arith.constant 0 : index
    %c0_3 = arith.constant 0 : index
    %2 = vector.load %arg3[%c0_2, %c0_3] : memref<1x128xf32, #tpu.memory_space<vmem>>, vector<1x128xf32>
    %c0_4 = arith.constant 0 : index
    %c0_5 = arith.constant 0 : index
    %3 = vector.load %arg4[%c0_4, %c0_5] : memref<1x128xf32, #tpu.memory_space<vmem>>, vector<1x128xf32>
    %cst = arith.constant dense<0.000000e+00> : vector<8xf32>
    %4 = vector.multi_reduction <add>, %1, %cst [1] : vector<8x128xf32> to vector<8xf32>
    %5 = vector.shape_cast %4 : vector<8xf32> to vector<8x1xf32>
    %cst_6 = arith.constant 1.280000e+02 : f32
    %6 = vector.broadcast %cst_6 : f32 to vector<8x1xf32>
    %7 = arith.divf %5, %6 : vector<8x1xf32>
    %8 = vector.broadcast %7 : vector<8x1xf32> to vector<8x128xf32>
    %9 = arith.subf %1, %8 : vector<8x128xf32>
    %10 = arith.mulf %9, %9 : vector<8x128xf32>
    %cst_7 = arith.constant dense<0.000000e+00> : vector<8xf32>
    %11 = vector.multi_reduction <add>, %10, %cst_7 [1] : vector<8x128xf32> to vector<8xf32>
    %12 = vector.shape_cast %11 : vector<8xf32> to vector<8x1xf32>
    %cst_8 = arith.constant 1.280000e+02 : f32
    %13 = vector.broadcast %cst_8 : f32 to vector<8x1xf32>
    %14 = arith.divf %12, %13 : vector<8x1xf32>
    %15 = vector.broadcast %7 : vector<8x1xf32> to vector<8x128xf32>
    %16 = arith.subf %1, %15 : vector<8x128xf32>
    %cst_9 = arith.constant 9.99999996E-13 : f32
    %17 = vector.broadcast %cst_9 : f32 to vector<8x1xf32>
    %18 = arith.addf %14, %17 : vector<8x1xf32>
    %19 = math.rsqrt %18 : vector<8x1xf32>
    %20 = vector.broadcast %19 : vector<8x1xf32> to vector<8x128xf32>
    %21 = arith.mulf %16, %20 : vector<8x128xf32>
    %22 = vector.broadcast %2 : vector<1x128xf32> to vector<8x128xf32>
    %23 = arith.mulf %21, %22 : vector<8x128xf32>
    %24 = vector.broadcast %3 : vector<1x128xf32> to vector<8x128xf32>
    %25 = arith.addf %23, %24 : vector<8x128xf32>
    %c0_10 = arith.constant 0 : index
    %c0_11 = arith.constant 0 : index
    %c0_12 = arith.constant 0 : index
    %26 = vector.load %arg2[%c0_10, %c0_11, %c0_12] : memref<1x1x8xf32, #tpu.memory_space<vmem>>, vector<1x1x8xf32>
    %27 = vector.shape_cast %26 : vector<1x1x8xf32> to vector<1x8xf32>
    %28 = vector.shape_cast %27 : vector<1x8xf32> to vector<1x8xf32>
    %29 = vector.broadcast %28 : vector<1x8xf32> to vector<8x8xf32>
    %30 = arith.truncf %25 : vector<8x128xf32> to vector<8x128xbf16>
    %c0_13 = arith.constant 0 : index
    %c0_14 = arith.constant 0 : index
    %c0_15 = arith.constant 0 : index
    %31 = vector.load %arg5[%c0_13, %c0_14, %c0_15] : memref<2x128x384xbf16, #tpu.memory_space<vmem>>, vector<1x128x384xbf16>
    %32 = vector.shape_cast %31 : vector<1x128x384xbf16> to vector<128x384xbf16>
    %cst_16 = arith.constant dense<0.000000e+00> : vector<8x384xf32>
    %33 = tpu.matmul %30, %32, %cst_16 {dimension_numbers = #tpu.dot_dimension_numbers<[1], [0], [0], [1], [0, 0, 1, 1], [], []>} : vector<8x128xbf16>, vector<128x384xbf16>, vector<8x384xf32> -> vector<8x384xf32>
    %c0_17 = arith.constant 0 : index
    %c0_18 = arith.constant 0 : index
    %c0_19 = arith.constant 0 : index
    %34 = vector.load %arg6[%c0_17, %c0_18, %c0_19] : memref<2x1x384xf32, #tpu.memory_space<vmem>>, vector<1x1x384xf32>
    %35 = vector.shape_cast %34 : vector<1x1x384xf32> to vector<1x384xf32>
    %36 = vector.broadcast %35 : vector<1x384xf32> to vector<8x384xf32>
    %37 = arith.addf %33, %36 : vector<8x384xf32>
    %38 = vector.extract_strided_slice %37 {offsets = [0, 0], sizes = [8, 128], strides = [1, 1]} : vector<8x384xf32> to vector<8x128xf32>
    %39 = vector.extract_strided_slice %37 {offsets = [0, 128], sizes = [8, 128], strides = [1, 1]} : vector<8x384xf32> to vector<8x128xf32>
    %40 = vector.extract_strided_slice %37 {offsets = [0, 256], sizes = [8, 128], strides = [1, 1]} : vector<8x384xf32> to vector<8x128xf32>
    %41 = vector.extract_strided_slice %38 {offsets = [0, 0], sizes = [8, 32], strides = [1, 1]} : vector<8x128xf32> to vector<8x32xf32>
    %42 = vector.extract_strided_slice %39 {offsets = [0, 0], sizes = [8, 32], strides = [1, 1]} : vector<8x128xf32> to vector<8x32xf32>
    %43 = vector.extract_strided_slice %40 {offsets = [0, 0], sizes = [8, 32], strides = [1, 1]} : vector<8x128xf32> to vector<8x32xf32>
    %cst_20 = arith.constant dense<0.000000e+00> : vector<8x8xf32>
    %44 = tpu.matmul %41, %42, %cst_20 {dimension_numbers = #tpu.dot_dimension_numbers<[1], [1], [0], [0], [0, 0, 1, 0], [], []>} : vector<8x32xf32>, vector<8x32xf32>, vector<8x8xf32> -> vector<8x8xf32>
    %45 = arith.addf %44, %29 : vector<8x8xf32>
    %cst_21 = arith.constant dense<0xFF800000> : vector<8xf32>
    %46 = vector.multi_reduction <maximumf>, %45, %cst_21 [1] : vector<8x8xf32> to vector<8xf32>
    %47 = vector.shape_cast %46 : vector<8xf32> to vector<8x1xf32>
    %48 = vector.broadcast %47 : vector<8x1xf32> to vector<8x8xf32>
    %49 = arith.subf %45, %48 : vector<8x8xf32>
    %50 = math.exp %49 : vector<8x8xf32>
    %cst_22 = arith.constant dense<0.000000e+00> : vector<8xf32>
    %51 = vector.multi_reduction <add>, %50, %cst_22 [1] : vector<8x8xf32> to vector<8xf32>
    %52 = vector.shape_cast %51 : vector<8xf32> to vector<8x1xf32>
    %53 = tpu.reciprocal %52 {approx = true} : vector<8x1xf32> -> vector<8x1xf32>
    %54 = vector.broadcast %53 : vector<8x1xf32> to vector<8x8xf32>
    %55 = arith.mulf %50, %54 : vector<8x8xf32>
    %cst_23 = arith.constant dense<0.000000e+00> : vector<8x32xf32>
    %56 = tpu.matmul %55, %43, %cst_23 {dimension_numbers = #tpu.dot_dimension_numbers<[1], [0], [0], [1], [0, 0, 1, 1], [], []>} : vector<8x8xf32>, vector<8x32xf32>, vector<8x32xf32> -> vector<8x32xf32>
    %57 = vector.extract_strided_slice %38 {offsets = [0, 32], sizes = [8, 32], strides = [1, 1]} : vector<8x128xf32> to vector<8x32xf32>
    %58 = vector.extract_strided_slice %39 {offsets = [0, 32], sizes = [8, 32], strides = [1, 1]} : vector<8x128xf32> to vector<8x32xf32>
    %59 = vector.extract_strided_slice %40 {offsets = [0, 32], sizes = [8, 32], strides = [1, 1]} : vector<8x128xf32> to vector<8x32xf32>
    %cst_24 = arith.constant dense<0.000000e+00> : vector<8x8xf32>
    %60 = tpu.matmul %57, %58, %cst_24 {dimension_numbers = #tpu.dot_dimension_numbers<[1], [1], [0], [0], [0, 0, 1, 0], [], []>} : vector<8x32xf32>, vector<8x32xf32>, vector<8x8xf32> -> vector<8x8xf32>
    %61 = arith.addf %60, %29 : vector<8x8xf32>
    %cst_25 = arith.constant dense<0xFF800000> : vector<8xf32>
    %62 = vector.multi_reduction <maximumf>, %61, %cst_25 [1] : vector<8x8xf32> to vector<8xf32>
    %63 = vector.shape_cast %62 : vector<8xf32> to vector<8x1xf32>
    %64 = vector.broadcast %63 : vector<8x1xf32> to vector<8x8xf32>
    %65 = arith.subf %61, %64 : vector<8x8xf32>
    %66 = math.exp %65 : vector<8x8xf32>
    %cst_26 = arith.constant dense<0.000000e+00> : vector<8xf32>
    %67 = vector.multi_reduction <add>, %66, %cst_26 [1] : vector<8x8xf32> to vector<8xf32>
    %68 = vector.shape_cast %67 : vector<8xf32> to vector<8x1xf32>
    %69 = tpu.reciprocal %68 {approx = true} : vector<8x1xf32> -> vector<8x1xf32>
    %70 = vector.broadcast %69 : vector<8x1xf32> to vector<8x8xf32>
    %71 = arith.mulf %66, %70 : vector<8x8xf32>
    %cst_27 = arith.constant dense<0.000000e+00> : vector<8x32xf32>
    %72 = tpu.matmul %71, %59, %cst_27 {dimension_numbers = #tpu.dot_dimension_numbers<[1], [0], [0], [1], [0, 0, 1, 1], [], []>} : vector<8x8xf32>, vector<8x32xf32>, vector<8x32xf32> -> vector<8x32xf32>
    %73 = vector.extract_strided_slice %38 {offsets = [0, 64], sizes = [8, 32], strides = [1, 1]} : vector<8x128xf32> to vector<8x32xf32>
    %74 = vector.extract_strided_slice %39 {offsets = [0, 64], sizes = [8, 32], strides = [1, 1]} : vector<8x128xf32> to vector<8x32xf32>
    %75 = vector.extract_strided_slice %40 {offsets = [0, 64], sizes = [8, 32], strides = [1, 1]} : vector<8x128xf32> to vector<8x32xf32>
    %cst_28 = arith.constant dense<0.000000e+00> : vector<8x8xf32>
    %76 = tpu.matmul %73, %74, %cst_28 {dimension_numbers = #tpu.dot_dimension_numbers<[1], [1], [0], [0], [0, 0, 1, 0], [], []>} : vector<8x32xf32>, vector<8x32xf32>, vector<8x8xf32> -> vector<8x8xf32>
    %77 = arith.addf %76, %29 : vector<8x8xf32>
    %cst_29 = arith.constant dense<0xFF800000> : vector<8xf32>
    %78 = vector.multi_reduction <maximumf>, %77, %cst_29 [1] : vector<8x8xf32> to vector<8xf32>
    %79 = vector.shape_cast %78 : vector<8xf32> to vector<8x1xf32>
    %80 = vector.broadcast %79 : vector<8x1xf32> to vector<8x8xf32>
    %81 = arith.subf %77, %80 : vector<8x8xf32>
    %82 = math.exp %81 : vector<8x8xf32>
    %cst_30 = arith.constant dense<0.000000e+00> : vector<8xf32>
    %83 = vector.multi_reduction <add>, %82, %cst_30 [1] : vector<8x8xf32> to vector<8xf32>
    %84 = vector.shape_cast %83 : vector<8xf32> to vector<8x1xf32>
    %85 = tpu.reciprocal %84 {approx = true} : vector<8x1xf32> -> vector<8x1xf32>
    %86 = vector.broadcast %85 : vector<8x1xf32> to vector<8x8xf32>
    %87 = arith.mulf %82, %86 : vector<8x8xf32>
    %cst_31 = arith.constant dense<0.000000e+00> : vector<8x32xf32>
    %88 = tpu.matmul %87, %75, %cst_31 {dimension_numbers = #tpu.dot_dimension_numbers<[1], [0], [0], [1], [0, 0, 1, 1], [], []>} : vector<8x8xf32>, vector<8x32xf32>, vector<8x32xf32> -> vector<8x32xf32>
    %89 = vector.extract_strided_slice %38 {offsets = [0, 96], sizes = [8, 32], strides = [1, 1]} : vector<8x128xf32> to vector<8x32xf32>
    %90 = vector.extract_strided_slice %39 {offsets = [0, 96], sizes = [8, 32], strides = [1, 1]} : vector<8x128xf32> to vector<8x32xf32>
    %91 = vector.extract_strided_slice %40 {offsets = [0, 96], sizes = [8, 32], strides = [1, 1]} : vector<8x128xf32> to vector<8x32xf32>
    %cst_32 = arith.constant dense<0.000000e+00> : vector<8x8xf32>
    %92 = tpu.matmul %89, %90, %cst_32 {dimension_numbers = #tpu.dot_dimension_numbers<[1], [1], [0], [0], [0, 0, 1, 0], [], []>} : vector<8x32xf32>, vector<8x32xf32>, vector<8x8xf32> -> vector<8x8xf32>
    %93 = arith.addf %92, %29 : vector<8x8xf32>
    %cst_33 = arith.constant dense<0xFF800000> : vector<8xf32>
    %94 = vector.multi_reduction <maximumf>, %93, %cst_33 [1] : vector<8x8xf32> to vector<8xf32>
    %95 = vector.shape_cast %94 : vector<8xf32> to vector<8x1xf32>
    %96 = vector.broadcast %95 : vector<8x1xf32> to vector<8x8xf32>
    %97 = arith.subf %93, %96 : vector<8x8xf32>
    %98 = math.exp %97 : vector<8x8xf32>
    %cst_34 = arith.constant dense<0.000000e+00> : vector<8xf32>
    %99 = vector.multi_reduction <add>, %98, %cst_34 [1] : vector<8x8xf32> to vector<8xf32>
    %100 = vector.shape_cast %99 : vector<8xf32> to vector<8x1xf32>
    %101 = tpu.reciprocal %100 {approx = true} : vector<8x1xf32> -> vector<8x1xf32>
    %102 = vector.broadcast %101 : vector<8x1xf32> to vector<8x8xf32>
    %103 = arith.mulf %98, %102 : vector<8x8xf32>
    %cst_35 = arith.constant dense<0.000000e+00> : vector<8x32xf32>
    %104 = tpu.matmul %103, %91, %cst_35 {dimension_numbers = #tpu.dot_dimension_numbers<[1], [0], [0], [1], [0, 0, 1, 1], [], []>} : vector<8x8xf32>, vector<8x32xf32>, vector<8x32xf32> -> vector<8x32xf32>
    %105 = tpu.concatenate %56, %72, %88, %104 in 1 : vector<8x32xf32>, vector<8x32xf32>, vector<8x32xf32>, vector<8x32xf32> -> vector<8x128xf32>
    %106 = arith.truncf %105 : vector<8x128xf32> to vector<8x128xbf16>
    %c0_36 = arith.constant 0 : index
    %c0_37 = arith.constant 0 : index
    %c0_38 = arith.constant 0 : index
    %107 = vector.load %arg7[%c0_36, %c0_37, %c0_38] : memref<2x128x128xbf16, #tpu.memory_space<vmem>>, vector<1x128x128xbf16>
    %108 = vector.shape_cast %107 : vector<1x128x128xbf16> to vector<128x128xbf16>
    %cst_39 = arith.constant dense<0.000000e+00> : vector<8x128xf32>
    %109 = tpu.matmul %106, %108, %cst_39 {dimension_numbers = #tpu.dot_dimension_numbers<[1], [0], [0], [1], [0, 0, 1, 1], [], []>} : vector<8x128xbf16>, vector<128x128xbf16>, vector<8x128xf32> -> vector<8x128xf32>
    %c0_40 = arith.constant 0 : index
    %c0_41 = arith.constant 0 : index
    %c0_42 = arith.constant 0 : index
    %110 = vector.load %arg8[%c0_40, %c0_41, %c0_42] : memref<2x1x128xf32, #tpu.memory_space<vmem>>, vector<1x1x128xf32>
    %111 = vector.shape_cast %110 : vector<1x1x128xf32> to vector<1x128xf32>
    %112 = vector.broadcast %111 : vector<1x128xf32> to vector<8x128xf32>
    %113 = arith.addf %109, %112 : vector<8x128xf32>
    %114 = arith.addf %113, %25 : vector<8x128xf32>
    %c0_43 = arith.constant 0 : index
    %c0_44 = arith.constant 0 : index
    %c0_45 = arith.constant 0 : index
    %115 = vector.load %arg9[%c0_43, %c0_44, %c0_45] : memref<2x1x128xf32, #tpu.memory_space<vmem>>, vector<1x1x128xf32>
    %116 = vector.shape_cast %115 : vector<1x1x128xf32> to vector<1x128xf32>
    %c0_46 = arith.constant 0 : index
    %c0_47 = arith.constant 0 : index
    %c0_48 = arith.constant 0 : index
    %117 = vector.load %arg10[%c0_46, %c0_47, %c0_48] : memref<2x1x128xf32, #tpu.memory_space<vmem>>, vector<1x1x128xf32>
    %118 = vector.shape_cast %117 : vector<1x1x128xf32> to vector<1x128xf32>
    %cst_49 = arith.constant dense<0.000000e+00> : vector<8xf32>
    %119 = vector.multi_reduction <add>, %114, %cst_49 [1] : vector<8x128xf32> to vector<8xf32>
    %120 = vector.shape_cast %119 : vector<8xf32> to vector<8x1xf32>
    %cst_50 = arith.constant 1.280000e+02 : f32
    %121 = vector.broadcast %cst_50 : f32 to vector<8x1xf32>
    %122 = arith.divf %120, %121 : vector<8x1xf32>
    %123 = vector.broadcast %122 : vector<8x1xf32> to vector<8x128xf32>
    %124 = arith.subf %114, %123 : vector<8x128xf32>
    %125 = arith.mulf %124, %124 : vector<8x128xf32>
    %cst_51 = arith.constant dense<0.000000e+00> : vector<8xf32>
    %126 = vector.multi_reduction <add>, %125, %cst_51 [1] : vector<8x128xf32> to vector<8xf32>
    %127 = vector.shape_cast %126 : vector<8xf32> to vector<8x1xf32>
    %cst_52 = arith.constant 1.280000e+02 : f32
    %128 = vector.broadcast %cst_52 : f32 to vector<8x1xf32>
    %129 = arith.divf %127, %128 : vector<8x1xf32>
    %130 = vector.broadcast %122 : vector<8x1xf32> to vector<8x128xf32>
    %131 = arith.subf %114, %130 : vector<8x128xf32>
    %cst_53 = arith.constant 9.99999996E-13 : f32
    %132 = vector.broadcast %cst_53 : f32 to vector<8x1xf32>
    %133 = arith.addf %129, %132 : vector<8x1xf32>
    %134 = math.rsqrt %133 : vector<8x1xf32>
    %135 = vector.broadcast %134 : vector<8x1xf32> to vector<8x128xf32>
    %136 = arith.mulf %131, %135 : vector<8x128xf32>
    %137 = vector.broadcast %116 : vector<1x128xf32> to vector<8x128xf32>
    %138 = arith.mulf %136, %137 : vector<8x128xf32>
    %139 = vector.broadcast %118 : vector<1x128xf32> to vector<8x128xf32>
    %140 = arith.addf %138, %139 : vector<8x128xf32>
    %141 = arith.truncf %140 : vector<8x128xf32> to vector<8x128xbf16>
    %c0_54 = arith.constant 0 : index
    %c0_55 = arith.constant 0 : index
    %c0_56 = arith.constant 0 : index
    %142 = vector.load %arg11[%c0_54, %c0_55, %c0_56] : memref<2x128x256xbf16, #tpu.memory_space<vmem>>, vector<1x128x256xbf16>
    %143 = vector.shape_cast %142 : vector<1x128x256xbf16> to vector<128x256xbf16>
    %cst_57 = arith.constant dense<0.000000e+00> : vector<8x256xf32>
    %144 = tpu.matmul %141, %143, %cst_57 {dimension_numbers = #tpu.dot_dimension_numbers<[1], [0], [0], [1], [0, 0, 1, 1], [], []>} : vector<8x128xbf16>, vector<128x256xbf16>, vector<8x256xf32> -> vector<8x256xf32>
    %c0_58 = arith.constant 0 : index
    %c0_59 = arith.constant 0 : index
    %c0_60 = arith.constant 0 : index
    %145 = vector.load %arg12[%c0_58, %c0_59, %c0_60] : memref<2x1x256xf32, #tpu.memory_space<vmem>>, vector<1x1x256xf32>
    %146 = vector.shape_cast %145 : vector<1x1x256xf32> to vector<1x256xf32>
    %147 = vector.broadcast %146 : vector<1x256xf32> to vector<8x256xf32>
    %148 = arith.addf %144, %147 : vector<8x256xf32>
    %cst_61 = arith.constant 5.000000e-01 : f32
    %149 = vector.broadcast %cst_61 : f32 to vector<8x256xf32>
    %150 = arith.mulf %149, %148 : vector<8x256xf32>
    %cst_62 = arith.constant 4.471500e-02 : f32
    %151 = vector.broadcast %cst_62 : f32 to vector<8x256xf32>
    %152 = arith.mulf %151, %148 : vector<8x256xf32>
    %153 = arith.mulf %152, %148 : vector<8x256xf32>
    %154 = arith.mulf %153, %148 : vector<8x256xf32>
    %155 = arith.addf %148, %154 : vector<8x256xf32>
    %cst_63 = arith.constant 0.797884583 : f32
    %156 = vector.broadcast %cst_63 : f32 to vector<8x256xf32>
    %157 = arith.mulf %156, %155 : vector<8x256xf32>
    %158 = math.tanh %157 : vector<8x256xf32>
    %cst_64 = arith.constant 1.000000e+00 : f32
    %159 = vector.broadcast %cst_64 : f32 to vector<8x256xf32>
    %160 = arith.addf %159, %158 : vector<8x256xf32>
    %161 = arith.mulf %150, %160 : vector<8x256xf32>
    %162 = arith.truncf %161 : vector<8x256xf32> to vector<8x256xbf16>
    %c0_65 = arith.constant 0 : index
    %c0_66 = arith.constant 0 : index
    %c0_67 = arith.constant 0 : index
    %163 = vector.load %arg13[%c0_65, %c0_66, %c0_67] : memref<2x256x128xbf16, #tpu.memory_space<vmem>>, vector<1x256x128xbf16>
    %164 = vector.shape_cast %163 : vector<1x256x128xbf16> to vector<256x128xbf16>
    %cst_68 = arith.constant dense<0.000000e+00> : vector<8x128xf32>
    %165 = tpu.matmul %162, %164, %cst_68 {dimension_numbers = #tpu.dot_dimension_numbers<[1], [0], [0], [1], [0, 0, 1, 1], [], []>} : vector<8x256xbf16>, vector<256x128xbf16>, vector<8x128xf32> -> vector<8x128xf32>
    %c0_69 = arith.constant 0 : index
    %c0_70 = arith.constant 0 : index
    %c0_71 = arith.constant 0 : index
    %166 = vector.load %arg14[%c0_69, %c0_70, %c0_71] : memref<2x1x128xf32, #tpu.memory_space<vmem>>, vector<1x1x128xf32>
    %167 = vector.shape_cast %166 : vector<1x1x128xf32> to vector<1x128xf32>
    %168 = vector.broadcast %167 : vector<1x128xf32> to vector<8x128xf32>
    %169 = arith.addf %165, %168 : vector<8x128xf32>
    %170 = arith.addf %169, %140 : vector<8x128xf32>
    %c0_72 = arith.constant 0 : index
    %c0_73 = arith.constant 0 : index
    %c0_74 = arith.constant 0 : index
    %171 = vector.load %arg15[%c0_72, %c0_73, %c0_74] : memref<2x1x128xf32, #tpu.memory_space<vmem>>, vector<1x1x128xf32>
    %172 = vector.shape_cast %171 : vector<1x1x128xf32> to vector<1x128xf32>
    %c0_75 = arith.constant 0 : index
    %c0_76 = arith.constant 0 : index
    %c0_77 = arith.constant 0 : index
    %173 = vector.load %arg16[%c0_75, %c0_76, %c0_77] : memref<2x1x128xf32, #tpu.memory_space<vmem>>, vector<1x1x128xf32>
    %174 = vector.shape_cast %173 : vector<1x1x128xf32> to vector<1x128xf32>
    %cst_78 = arith.constant dense<0.000000e+00> : vector<8xf32>
    %175 = vector.multi_reduction <add>, %170, %cst_78 [1] : vector<8x128xf32> to vector<8xf32>
    %176 = vector.shape_cast %175 : vector<8xf32> to vector<8x1xf32>
    %cst_79 = arith.constant 1.280000e+02 : f32
    %177 = vector.broadcast %cst_79 : f32 to vector<8x1xf32>
    %178 = arith.divf %176, %177 : vector<8x1xf32>
    %179 = vector.broadcast %178 : vector<8x1xf32> to vector<8x128xf32>
    %180 = arith.subf %170, %179 : vector<8x128xf32>
    %181 = arith.mulf %180, %180 : vector<8x128xf32>
    %cst_80 = arith.constant dense<0.000000e+00> : vector<8xf32>
    %182 = vector.multi_reduction <add>, %181, %cst_80 [1] : vector<8x128xf32> to vector<8xf32>
    %183 = vector.shape_cast %182 : vector<8xf32> to vector<8x1xf32>
    %cst_81 = arith.constant 1.280000e+02 : f32
    %184 = vector.broadcast %cst_81 : f32 to vector<8x1xf32>
    %185 = arith.divf %183, %184 : vector<8x1xf32>
    %186 = vector.broadcast %178 : vector<8x1xf32> to vector<8x128xf32>
    %187 = arith.subf %170, %186 : vector<8x128xf32>
    %cst_82 = arith.constant 9.99999996E-13 : f32
    %188 = vector.broadcast %cst_82 : f32 to vector<8x1xf32>
    %189 = arith.addf %185, %188 : vector<8x1xf32>
    %190 = math.rsqrt %189 : vector<8x1xf32>
    %191 = vector.broadcast %190 : vector<8x1xf32> to vector<8x128xf32>
    %192 = arith.mulf %187, %191 : vector<8x128xf32>
    %193 = vector.broadcast %172 : vector<1x128xf32> to vector<8x128xf32>
    %194 = arith.mulf %192, %193 : vector<8x128xf32>
    %195 = vector.broadcast %174 : vector<1x128xf32> to vector<8x128xf32>
    %196 = arith.addf %194, %195 : vector<8x128xf32>
    %197 = arith.truncf %196 : vector<8x128xf32> to vector<8x128xbf16>
    %c1 = arith.constant 1 : index
    %c0_83 = arith.constant 0 : index
    %c0_84 = arith.constant 0 : index
    %198 = vector.load %arg5[%c1, %c0_83, %c0_84] : memref<2x128x384xbf16, #tpu.memory_space<vmem>>, vector<1x128x384xbf16>
    %199 = vector.shape_cast %198 : vector<1x128x384xbf16> to vector<128x384xbf16>
    %cst_85 = arith.constant dense<0.000000e+00> : vector<8x384xf32>
    %200 = tpu.matmul %197, %199, %cst_85 {dimension_numbers = #tpu.dot_dimension_numbers<[1], [0], [0], [1], [0, 0, 1, 1], [], []>} : vector<8x128xbf16>, vector<128x384xbf16>, vector<8x384xf32> -> vector<8x384xf32>
    %c1_86 = arith.constant 1 : index
    %c0_87 = arith.constant 0 : index
    %c0_88 = arith.constant 0 : index
    %201 = vector.load %arg6[%c1_86, %c0_87, %c0_88] : memref<2x1x384xf32, #tpu.memory_space<vmem>>, vector<1x1x384xf32>
    %202 = vector.shape_cast %201 : vector<1x1x384xf32> to vector<1x384xf32>
    %203 = vector.broadcast %202 : vector<1x384xf32> to vector<8x384xf32>
    %204 = arith.addf %200, %203 : vector<8x384xf32>
    %205 = vector.extract_strided_slice %204 {offsets = [0, 0], sizes = [8, 128], strides = [1, 1]} : vector<8x384xf32> to vector<8x128xf32>
    %206 = vector.extract_strided_slice %204 {offsets = [0, 128], sizes = [8, 128], strides = [1, 1]} : vector<8x384xf32> to vector<8x128xf32>
    %207 = vector.extract_strided_slice %204 {offsets = [0, 256], sizes = [8, 128], strides = [1, 1]} : vector<8x384xf32> to vector<8x128xf32>
    %208 = vector.extract_strided_slice %205 {offsets = [0, 0], sizes = [8, 32], strides = [1, 1]} : vector<8x128xf32> to vector<8x32xf32>
    %209 = vector.extract_strided_slice %206 {offsets = [0, 0], sizes = [8, 32], strides = [1, 1]} : vector<8x128xf32> to vector<8x32xf32>
    %210 = vector.extract_strided_slice %207 {offsets = [0, 0], sizes = [8, 32], strides = [1, 1]} : vector<8x128xf32> to vector<8x32xf32>
    %cst_89 = arith.constant dense<0.000000e+00> : vector<8x8xf32>
    %211 = tpu.matmul %208, %209, %cst_89 {dimension_numbers = #tpu.dot_dimension_numbers<[1], [1], [0], [0], [0, 0, 1, 0], [], []>} : vector<8x32xf32>, vector<8x32xf32>, vector<8x8xf32> -> vector<8x8xf32>
    %212 = arith.addf %211, %29 : vector<8x8xf32>
    %cst_90 = arith.constant dense<0xFF800000> : vector<8xf32>
    %213 = vector.multi_reduction <maximumf>, %212, %cst_90 [1] : vector<8x8xf32> to vector<8xf32>
    %214 = vector.shape_cast %213 : vector<8xf32> to vector<8x1xf32>
    %215 = vector.broadcast %214 : vector<8x1xf32> to vector<8x8xf32>
    %216 = arith.subf %212, %215 : vector<8x8xf32>
    %217 = math.exp %216 : vector<8x8xf32>
    %cst_91 = arith.constant dense<0.000000e+00> : vector<8xf32>
    %218 = vector.multi_reduction <add>, %217, %cst_91 [1] : vector<8x8xf32> to vector<8xf32>
    %219 = vector.shape_cast %218 : vector<8xf32> to vector<8x1xf32>
    %220 = tpu.reciprocal %219 {approx = true} : vector<8x1xf32> -> vector<8x1xf32>
    %221 = vector.broadcast %220 : vector<8x1xf32> to vector<8x8xf32>
    %222 = arith.mulf %217, %221 : vector<8x8xf32>
    %cst_92 = arith.constant dense<0.000000e+00> : vector<8x32xf32>
    %223 = tpu.matmul %222, %210, %cst_92 {dimension_numbers = #tpu.dot_dimension_numbers<[1], [0], [0], [1], [0, 0, 1, 1], [], []>} : vector<8x8xf32>, vector<8x32xf32>, vector<8x32xf32> -> vector<8x32xf32>
    %224 = vector.extract_strided_slice %205 {offsets = [0, 32], sizes = [8, 32], strides = [1, 1]} : vector<8x128xf32> to vector<8x32xf32>
    %225 = vector.extract_strided_slice %206 {offsets = [0, 32], sizes = [8, 32], strides = [1, 1]} : vector<8x128xf32> to vector<8x32xf32>
    %226 = vector.extract_strided_slice %207 {offsets = [0, 32], sizes = [8, 32], strides = [1, 1]} : vector<8x128xf32> to vector<8x32xf32>
    %cst_93 = arith.constant dense<0.000000e+00> : vector<8x8xf32>
    %227 = tpu.matmul %224, %225, %cst_93 {dimension_numbers = #tpu.dot_dimension_numbers<[1], [1], [0], [0], [0, 0, 1, 0], [], []>} : vector<8x32xf32>, vector<8x32xf32>, vector<8x8xf32> -> vector<8x8xf32>
    %228 = arith.addf %227, %29 : vector<8x8xf32>
    %cst_94 = arith.constant dense<0xFF800000> : vector<8xf32>
    %229 = vector.multi_reduction <maximumf>, %228, %cst_94 [1] : vector<8x8xf32> to vector<8xf32>
    %230 = vector.shape_cast %229 : vector<8xf32> to vector<8x1xf32>
    %231 = vector.broadcast %230 : vector<8x1xf32> to vector<8x8xf32>
    %232 = arith.subf %228, %231 : vector<8x8xf32>
    %233 = math.exp %232 : vector<8x8xf32>
    %cst_95 = arith.constant dense<0.000000e+00> : vector<8xf32>
    %234 = vector.multi_reduction <add>, %233, %cst_95 [1] : vector<8x8xf32> to vector<8xf32>
    %235 = vector.shape_cast %234 : vector<8xf32> to vector<8x1xf32>
    %236 = tpu.reciprocal %235 {approx = true} : vector<8x1xf32> -> vector<8x1xf32>
    %237 = vector.broadcast %236 : vector<8x1xf32> to vector<8x8xf32>
    %238 = arith.mulf %233, %237 : vector<8x8xf32>
    %cst_96 = arith.constant dense<0.000000e+00> : vector<8x32xf32>
    %239 = tpu.matmul %238, %226, %cst_96 {dimension_numbers = #tpu.dot_dimension_numbers<[1], [0], [0], [1], [0, 0, 1, 1], [], []>} : vector<8x8xf32>, vector<8x32xf32>, vector<8x32xf32> -> vector<8x32xf32>
    %240 = vector.extract_strided_slice %205 {offsets = [0, 64], sizes = [8, 32], strides = [1, 1]} : vector<8x128xf32> to vector<8x32xf32>
    %241 = vector.extract_strided_slice %206 {offsets = [0, 64], sizes = [8, 32], strides = [1, 1]} : vector<8x128xf32> to vector<8x32xf32>
    %242 = vector.extract_strided_slice %207 {offsets = [0, 64], sizes = [8, 32], strides = [1, 1]} : vector<8x128xf32> to vector<8x32xf32>
    %cst_97 = arith.constant dense<0.000000e+00> : vector<8x8xf32>
    %243 = tpu.matmul %240, %241, %cst_97 {dimension_numbers = #tpu.dot_dimension_numbers<[1], [1], [0], [0], [0, 0, 1, 0], [], []>} : vector<8x32xf32>, vector<8x32xf32>, vector<8x8xf32> -> vector<8x8xf32>
    %244 = arith.addf %243, %29 : vector<8x8xf32>
    %cst_98 = arith.constant dense<0xFF800000> : vector<8xf32>
    %245 = vector.multi_reduction <maximumf>, %244, %cst_98 [1] : vector<8x8xf32> to vector<8xf32>
    %246 = vector.shape_cast %245 : vector<8xf32> to vector<8x1xf32>
    %247 = vector.broadcast %246 : vector<8x1xf32> to vector<8x8xf32>
    %248 = arith.subf %244, %247 : vector<8x8xf32>
    %249 = math.exp %248 : vector<8x8xf32>
    %cst_99 = arith.constant dense<0.000000e+00> : vector<8xf32>
    %250 = vector.multi_reduction <add>, %249, %cst_99 [1] : vector<8x8xf32> to vector<8xf32>
    %251 = vector.shape_cast %250 : vector<8xf32> to vector<8x1xf32>
    %252 = tpu.reciprocal %251 {approx = true} : vector<8x1xf32> -> vector<8x1xf32>
    %253 = vector.broadcast %252 : vector<8x1xf32> to vector<8x8xf32>
    %254 = arith.mulf %249, %253 : vector<8x8xf32>
    %cst_100 = arith.constant dense<0.000000e+00> : vector<8x32xf32>
    %255 = tpu.matmul %254, %242, %cst_100 {dimension_numbers = #tpu.dot_dimension_numbers<[1], [0], [0], [1], [0, 0, 1, 1], [], []>} : vector<8x8xf32>, vector<8x32xf32>, vector<8x32xf32> -> vector<8x32xf32>
    %256 = vector.extract_strided_slice %205 {offsets = [0, 96], sizes = [8, 32], strides = [1, 1]} : vector<8x128xf32> to vector<8x32xf32>
    %257 = vector.extract_strided_slice %206 {offsets = [0, 96], sizes = [8, 32], strides = [1, 1]} : vector<8x128xf32> to vector<8x32xf32>
    %258 = vector.extract_strided_slice %207 {offsets = [0, 96], sizes = [8, 32], strides = [1, 1]} : vector<8x128xf32> to vector<8x32xf32>
    %cst_101 = arith.constant dense<0.000000e+00> : vector<8x8xf32>
    %259 = tpu.matmul %256, %257, %cst_101 {dimension_numbers = #tpu.dot_dimension_numbers<[1], [1], [0], [0], [0, 0, 1, 0], [], []>} : vector<8x32xf32>, vector<8x32xf32>, vector<8x8xf32> -> vector<8x8xf32>
    %260 = arith.addf %259, %29 : vector<8x8xf32>
    %cst_102 = arith.constant dense<0xFF800000> : vector<8xf32>
    %261 = vector.multi_reduction <maximumf>, %260, %cst_102 [1] : vector<8x8xf32> to vector<8xf32>
    %262 = vector.shape_cast %261 : vector<8xf32> to vector<8x1xf32>
    %263 = vector.broadcast %262 : vector<8x1xf32> to vector<8x8xf32>
    %264 = arith.subf %260, %263 : vector<8x8xf32>
    %265 = math.exp %264 : vector<8x8xf32>
    %cst_103 = arith.constant dense<0.000000e+00> : vector<8xf32>
    %266 = vector.multi_reduction <add>, %265, %cst_103 [1] : vector<8x8xf32> to vector<8xf32>
    %267 = vector.shape_cast %266 : vector<8xf32> to vector<8x1xf32>
    %268 = tpu.reciprocal %267 {approx = true} : vector<8x1xf32> -> vector<8x1xf32>
    %269 = vector.broadcast %268 : vector<8x1xf32> to vector<8x8xf32>
    %270 = arith.mulf %265, %269 : vector<8x8xf32>
    %cst_104 = arith.constant dense<0.000000e+00> : vector<8x32xf32>
    %271 = tpu.matmul %270, %258, %cst_104 {dimension_numbers = #tpu.dot_dimension_numbers<[1], [0], [0], [1], [0, 0, 1, 1], [], []>} : vector<8x8xf32>, vector<8x32xf32>, vector<8x32xf32> -> vector<8x32xf32>
    %272 = tpu.concatenate %223, %239, %255, %271 in 1 : vector<8x32xf32>, vector<8x32xf32>, vector<8x32xf32>, vector<8x32xf32> -> vector<8x128xf32>
    %273 = arith.truncf %272 : vector<8x128xf32> to vector<8x128xbf16>
    %c1_105 = arith.constant 1 : index
    %c0_106 = arith.constant 0 : index
    %c0_107 = arith.constant 0 : index
    %274 = vector.load %arg7[%c1_105, %c0_106, %c0_107] : memref<2x128x128xbf16, #tpu.memory_space<vmem>>, vector<1x128x128xbf16>
    %275 = vector.shape_cast %274 : vector<1x128x128xbf16> to vector<128x128xbf16>
    %cst_108 = arith.constant dense<0.000000e+00> : vector<8x128xf32>
    %276 = tpu.matmul %273, %275, %cst_108 {dimension_numbers = #tpu.dot_dimension_numbers<[1], [0], [0], [1], [0, 0, 1, 1], [], []>} : vector<8x128xbf16>, vector<128x128xbf16>, vector<8x128xf32> -> vector<8x128xf32>
    %c1_109 = arith.constant 1 : index
    %c0_110 = arith.constant 0 : index
    %c0_111 = arith.constant 0 : index
    %277 = vector.load %arg8[%c1_109, %c0_110, %c0_111] : memref<2x1x128xf32, #tpu.memory_space<vmem>>, vector<1x1x128xf32>
    %278 = vector.shape_cast %277 : vector<1x1x128xf32> to vector<1x128xf32>
    %279 = vector.broadcast %278 : vector<1x128xf32> to vector<8x128xf32>
    %280 = arith.addf %276, %279 : vector<8x128xf32>
    %281 = arith.addf %280, %196 : vector<8x128xf32>
    %c1_112 = arith.constant 1 : index
    %c0_113 = arith.constant 0 : index
    %c0_114 = arith.constant 0 : index
    %282 = vector.load %arg9[%c1_112, %c0_113, %c0_114] : memref<2x1x128xf32, #tpu.memory_space<vmem>>, vector<1x1x128xf32>
    %283 = vector.shape_cast %282 : vector<1x1x128xf32> to vector<1x128xf32>
    %c1_115 = arith.constant 1 : index
    %c0_116 = arith.constant 0 : index
    %c0_117 = arith.constant 0 : index
    %284 = vector.load %arg10[%c1_115, %c0_116, %c0_117] : memref<2x1x128xf32, #tpu.memory_space<vmem>>, vector<1x1x128xf32>
    %285 = vector.shape_cast %284 : vector<1x1x128xf32> to vector<1x128xf32>
    %cst_118 = arith.constant dense<0.000000e+00> : vector<8xf32>
    %286 = vector.multi_reduction <add>, %281, %cst_118 [1] : vector<8x128xf32> to vector<8xf32>
    %287 = vector.shape_cast %286 : vector<8xf32> to vector<8x1xf32>
    %cst_119 = arith.constant 1.280000e+02 : f32
    %288 = vector.broadcast %cst_119 : f32 to vector<8x1xf32>
    %289 = arith.divf %287, %288 : vector<8x1xf32>
    %290 = vector.broadcast %289 : vector<8x1xf32> to vector<8x128xf32>
    %291 = arith.subf %281, %290 : vector<8x128xf32>
    %292 = arith.mulf %291, %291 : vector<8x128xf32>
    %cst_120 = arith.constant dense<0.000000e+00> : vector<8xf32>
    %293 = vector.multi_reduction <add>, %292, %cst_120 [1] : vector<8x128xf32> to vector<8xf32>
    %294 = vector.shape_cast %293 : vector<8xf32> to vector<8x1xf32>
    %cst_121 = arith.constant 1.280000e+02 : f32
    %295 = vector.broadcast %cst_121 : f32 to vector<8x1xf32>
    %296 = arith.divf %294, %295 : vector<8x1xf32>
    %297 = vector.broadcast %289 : vector<8x1xf32> to vector<8x128xf32>
    %298 = arith.subf %281, %297 : vector<8x128xf32>
    %cst_122 = arith.constant 9.99999996E-13 : f32
    %299 = vector.broadcast %cst_122 : f32 to vector<8x1xf32>
    %300 = arith.addf %296, %299 : vector<8x1xf32>
    %301 = math.rsqrt %300 : vector<8x1xf32>
    %302 = vector.broadcast %301 : vector<8x1xf32> to vector<8x128xf32>
    %303 = arith.mulf %298, %302 : vector<8x128xf32>
    %304 = vector.broadcast %283 : vector<1x128xf32> to vector<8x128xf32>
    %305 = arith.mulf %303, %304 : vector<8x128xf32>
    %306 = vector.broadcast %285 : vector<1x128xf32> to vector<8x128xf32>
    %307 = arith.addf %305, %306 : vector<8x128xf32>
    %308 = arith.truncf %307 : vector<8x128xf32> to vector<8x128xbf16>
    %c1_123 = arith.constant 1 : index
    %c0_124 = arith.constant 0 : index
    %c0_125 = arith.constant 0 : index
    %309 = vector.load %arg11[%c1_123, %c0_124, %c0_125] : memref<2x128x256xbf16, #tpu.memory_space<vmem>>, vector<1x128x256xbf16>
    %310 = vector.shape_cast %309 : vector<1x128x256xbf16> to vector<128x256xbf16>
    %cst_126 = arith.constant dense<0.000000e+00> : vector<8x256xf32>
    %311 = tpu.matmul %308, %310, %cst_126 {dimension_numbers = #tpu.dot_dimension_numbers<[1], [0], [0], [1], [0, 0, 1, 1], [], []>} : vector<8x128xbf16>, vector<128x256xbf16>, vector<8x256xf32> -> vector<8x256xf32>
    %c1_127 = arith.constant 1 : index
    %c0_128 = arith.constant 0 : index
    %c0_129 = arith.constant 0 : index
    %312 = vector.load %arg12[%c1_127, %c0_128, %c0_129] : memref<2x1x256xf32, #tpu.memory_space<vmem>>, vector<1x1x256xf32>
    %313 = vector.shape_cast %312 : vector<1x1x256xf32> to vector<1x256xf32>
    %314 = vector.broadcast %313 : vector<1x256xf32> to vector<8x256xf32>
    %315 = arith.addf %311, %314 : vector<8x256xf32>
    %cst_130 = arith.constant 5.000000e-01 : f32
    %316 = vector.broadcast %cst_130 : f32 to vector<8x256xf32>
    %317 = arith.mulf %316, %315 : vector<8x256xf32>
    %cst_131 = arith.constant 4.471500e-02 : f32
    %318 = vector.broadcast %cst_131 : f32 to vector<8x256xf32>
    %319 = arith.mulf %318, %315 : vector<8x256xf32>
    %320 = arith.mulf %319, %315 : vector<8x256xf32>
    %321 = arith.mulf %320, %315 : vector<8x256xf32>
    %322 = arith.addf %315, %321 : vector<8x256xf32>
    %cst_132 = arith.constant 0.797884583 : f32
    %323 = vector.broadcast %cst_132 : f32 to vector<8x256xf32>
    %324 = arith.mulf %323, %322 : vector<8x256xf32>
    %325 = math.tanh %324 : vector<8x256xf32>
    %cst_133 = arith.constant 1.000000e+00 : f32
    %326 = vector.broadcast %cst_133 : f32 to vector<8x256xf32>
    %327 = arith.addf %326, %325 : vector<8x256xf32>
    %328 = arith.mulf %317, %327 : vector<8x256xf32>
    %329 = arith.truncf %328 : vector<8x256xf32> to vector<8x256xbf16>
    %c1_134 = arith.constant 1 : index
    %c0_135 = arith.constant 0 : index
    %c0_136 = arith.constant 0 : index
    %330 = vector.load %arg13[%c1_134, %c0_135, %c0_136] : memref<2x256x128xbf16, #tpu.memory_space<vmem>>, vector<1x256x128xbf16>
    %331 = vector.shape_cast %330 : vector<1x256x128xbf16> to vector<256x128xbf16>
    %cst_137 = arith.constant dense<0.000000e+00> : vector<8x128xf32>
    %332 = tpu.matmul %329, %331, %cst_137 {dimension_numbers = #tpu.dot_dimension_numbers<[1], [0], [0], [1], [0, 0, 1, 1], [], []>} : vector<8x256xbf16>, vector<256x128xbf16>, vector<8x128xf32> -> vector<8x128xf32>
    %c1_138 = arith.constant 1 : index
    %c0_139 = arith.constant 0 : index
    %c0_140 = arith.constant 0 : index
    %333 = vector.load %arg14[%c1_138, %c0_139, %c0_140] : memref<2x1x128xf32, #tpu.memory_space<vmem>>, vector<1x1x128xf32>
    %334 = vector.shape_cast %333 : vector<1x1x128xf32> to vector<1x128xf32>
    %335 = vector.broadcast %334 : vector<1x128xf32> to vector<8x128xf32>
    %336 = arith.addf %332, %335 : vector<8x128xf32>
    %337 = arith.addf %336, %307 : vector<8x128xf32>
    %c1_141 = arith.constant 1 : index
    %c0_142 = arith.constant 0 : index
    %c0_143 = arith.constant 0 : index
    %338 = vector.load %arg15[%c1_141, %c0_142, %c0_143] : memref<2x1x128xf32, #tpu.memory_space<vmem>>, vector<1x1x128xf32>
    %339 = vector.shape_cast %338 : vector<1x1x128xf32> to vector<1x128xf32>
    %c1_144 = arith.constant 1 : index
    %c0_145 = arith.constant 0 : index
    %c0_146 = arith.constant 0 : index
    %340 = vector.load %arg16[%c1_144, %c0_145, %c0_146] : memref<2x1x128xf32, #tpu.memory_space<vmem>>, vector<1x1x128xf32>
    %341 = vector.shape_cast %340 : vector<1x1x128xf32> to vector<1x128xf32>
    %cst_147 = arith.constant dense<0.000000e+00> : vector<8xf32>
    %342 = vector.multi_reduction <add>, %337, %cst_147 [1] : vector<8x128xf32> to vector<8xf32>
    %343 = vector.shape_cast %342 : vector<8xf32> to vector<8x1xf32>
    %cst_148 = arith.constant 1.280000e+02 : f32
    %344 = vector.broadcast %cst_148 : f32 to vector<8x1xf32>
    %345 = arith.divf %343, %344 : vector<8x1xf32>
    %346 = vector.broadcast %345 : vector<8x1xf32> to vector<8x128xf32>
    %347 = arith.subf %337, %346 : vector<8x128xf32>
    %348 = arith.mulf %347, %347 : vector<8x128xf32>
    %cst_149 = arith.constant dense<0.000000e+00> : vector<8xf32>
    %349 = vector.multi_reduction <add>, %348, %cst_149 [1] : vector<8x128xf32> to vector<8xf32>
    %350 = vector.shape_cast %349 : vector<8xf32> to vector<8x1xf32>
    %cst_150 = arith.constant 1.280000e+02 : f32
    %351 = vector.broadcast %cst_150 : f32 to vector<8x1xf32>
    %352 = arith.divf %350, %351 : vector<8x1xf32>
    %353 = vector.broadcast %345 : vector<8x1xf32> to vector<8x128xf32>
    %354 = arith.subf %337, %353 : vector<8x128xf32>
    %cst_151 = arith.constant 9.99999996E-13 : f32
    %355 = vector.broadcast %cst_151 : f32 to vector<8x1xf32>
    %356 = arith.addf %352, %355 : vector<8x1xf32>
    %357 = math.rsqrt %356 : vector<8x1xf32>
    %358 = vector.broadcast %357 : vector<8x1xf32> to vector<8x128xf32>
    %359 = arith.mulf %354, %358 : vector<8x128xf32>
    %360 = vector.broadcast %339 : vector<1x128xf32> to vector<8x128xf32>
    %361 = arith.mulf %359, %360 : vector<8x128xf32>
    %362 = vector.broadcast %341 : vector<1x128xf32> to vector<8x128xf32>
    %363 = arith.addf %361, %362 : vector<8x128xf32>
    %364 = arith.truncf %363 : vector<8x128xf32> to vector<8x128xbf16>
    %c0_152 = arith.constant 0 : index
    %c0_153 = arith.constant 0 : index
    %365 = vector.load %arg17[%c0_152, %c0_153] : memref<128x128xbf16, #tpu.memory_space<vmem>>, vector<128x128xbf16>
    %cst_154 = arith.constant dense<0.000000e+00> : vector<8x128xf32>
    %366 = tpu.matmul %364, %365, %cst_154 {dimension_numbers = #tpu.dot_dimension_numbers<[1], [0], [0], [1], [0, 0, 1, 1], [], []>} : vector<8x128xbf16>, vector<128x128xbf16>, vector<8x128xf32> -> vector<8x128xf32>
    %c0_155 = arith.constant 0 : index
    %c0_156 = arith.constant 0 : index
    %367 = vector.load %arg18[%c0_155, %c0_156] : memref<1x128xf32, #tpu.memory_space<vmem>>, vector<1x128xf32>
    %368 = vector.broadcast %367 : vector<1x128xf32> to vector<8x128xf32>
    %369 = arith.addf %366, %368 : vector<8x128xf32>
    %370 = math.tanh %369 : vector<8x128xf32>
    %371 = arith.truncf %370 : vector<8x128xf32> to vector<8x128xbf16>
    %c0_157 = arith.constant 0 : index
    %c0_158 = arith.constant 0 : index
    %372 = vector.load %arg19[%c0_157, %c0_158] : memref<128x128xbf16, #tpu.memory_space<vmem>>, vector<128x128xbf16>
    %cst_159 = arith.constant dense<0.000000e+00> : vector<8x128xf32>
    %373 = tpu.matmul %371, %372, %cst_159 {dimension_numbers = #tpu.dot_dimension_numbers<[1], [0], [0], [1], [0, 0, 1, 1], [], []>} : vector<8x128xbf16>, vector<128x128xbf16>, vector<8x128xf32> -> vector<8x128xf32>
    %c0_160 = arith.constant 0 : index
    %c0_161 = arith.constant 0 : index
    %374 = vector.load %arg20[%c0_160, %c0_161] : memref<1x128xf32, #tpu.memory_space<vmem>>, vector<1x128xf32>
    %375 = vector.broadcast %374 : vector<1x128xf32> to vector<8x128xf32>
    %376 = arith.addf %373, %375 : vector<8x128xf32>
    %c0_162 = arith.constant 0 : index
    %c0_163 = arith.constant 0 : index
    %c0_164 = arith.constant 0 : index
    %377 = vector.load %arg21[%c0_162, %c0_163, %c0_164] : memref<1x8x128xf32, #tpu.memory_space<vmem>>, vector<1x8x128xf32>
    %378 = vector.shape_cast %377 : vector<1x8x128xf32> to vector<8x128xf32>
    %379 = vector.shape_cast %376 : vector<8x128xf32> to vector<1x8x128xf32>
    tpu.vector_store %arg21[%c0_162, %c0_163, %c0_164], %379 {strides = array<i32>} : memref<1x8x128xf32, #tpu.memory_space<vmem>>, vector<1x8x128xf32>,
    return
  }
  func.func @transform_0(%arg0: i32) -> (i32, i32, i32) {
    %c0_i32 = arith.constant 0 : i32
    %c0_i32_0 = arith.constant 0 : i32
    %c0_i32_1 = arith.constant 0 : i32
    return %arg0, %c0_i32, %c0_i32_0 : i32, i32, i32
  }
  func.func @transform_1(%arg0: i32) -> (i32, i32, i32) {
    %c0_i32 = arith.constant 0 : i32
    %c0_i32_0 = arith.constant 0 : i32
    %c0_i32_1 = arith.constant 0 : i32
    return %arg0, %c0_i32, %c0_i32_0 : i32, i32, i32
  }
  func.func @transform_2(%arg0: i32) -> (i32, i32) {
    %c0_i32 = arith.constant 0 : i32
    %c0_i32_0 = arith.constant 0 : i32
    %c0_i32_1 = arith.constant 0 : i32
    return %c0_i32, %c0_i32_0 : i32, i32
  }
  func.func @transform_3(%arg0: i32) -> (i32, i32) {
    %c0_i32 = arith.constant 0 : i32
    %c0_i32_0 = arith.constant 0 : i32
    %c0_i32_1 = arith.constant 0 : i32
    return %c0_i32, %c0_i32_0 : i32, i32
  }
  func.func @transform_4(%arg0: i32) -> (i32, i32, i32) {
    %c0_i32 = arith.constant 0 : i32
    %c0_i32_0 = arith.constant 0 : i32
    %c0_i32_1 = arith.constant 0 : i32
    %c0_i32_2 = arith.constant 0 : i32
    return %c0_i32, %c0_i32_0, %c0_i32_1 : i32, i32, i32
  }
  func.func @transform_5(%arg0: i32) -> (i32, i32, i32) {
    %c0_i32 = arith.constant 0 : i32
    %c0_i32_0 = arith.constant 0 : i32
    %c0_i32_1 = arith.constant 0 : i32
    %c0_i32_2 = arith.constant 0 : i32
    return %c0_i32, %c0_i32_0, %c0_i32_1 : i32, i32, i32
  }
  func.func @transform_6(%arg0: i32) -> (i32, i32, i32) {
    %c0_i32 = arith.constant 0 : i32
    %c0_i32_0 = arith.constant 0 : i32
    %c0_i32_1 = arith.constant 0 : i32
    %c0_i32_2 = arith.constant 0 : i32
    return %c0_i32, %c0_i32_0, %c0_i32_1 : i32, i32, i32
  }
  func.func @transform_7(%arg0: i32) -> (i32, i32, i32) {
    %c0_i32 = arith.constant 0 : i32
    %c0_i32_0 = arith.constant 0 : i32
    %c0_i32_1 = arith.constant 0 : i32
    %c0_i32_2 = arith.constant 0 : i32
    return %c0_i32, %c0_i32_0, %c0_i32_1 : i32, i32, i32
  }
  func.func @transform_8(%arg0: i32) -> (i32, i32, i32) {
    %c0_i32 = arith.constant 0 : i32
    %c0_i32_0 = arith.constant 0 : i32
    %c0_i32_1 = arith.constant 0 : i32
    %c0_i32_2 = arith.constant 0 : i32
    return %c0_i32, %c0_i32_0, %c0_i32_1 : i32, i32, i32
  }
  func.func @transform_9(%arg0: i32) -> (i32, i32, i32) {
    %c0_i32 = arith.constant 0 : i32
    %c0_i32_0 = arith.constant 0 : i32
    %c0_i32_1 = arith.constant 0 : i32
    %c0_i32_2 = arith.constant 0 : i32
    return %c0_i32, %c0_i32_0, %c0_i32_1 : i32, i32, i32
  }
  func.func @transform_10(%arg0: i32) -> (i32, i32, i32) {
    %c0_i32 = arith.constant 0 : i32
    %c0_i32_0 = arith.constant 0 : i32
    %c0_i32_1 = arith.constant 0 : i32
    %c0_i32_2 = arith.constant 0 : i32
    return %c0_i32, %c0_i32_0, %c0_i32_1 : i32, i32, i32
  }
  func.func @transform_11(%arg0: i32) -> (i32, i32, i32) {
    %c0_i32 = arith.constant 0 : i32
    %c0_i32_0 = arith.constant 0 : i32
    %c0_i32_1 = arith.constant 0 : i32
    %c0_i32_2 = arith.constant 0 : i32
    return %c0_i32, %c0_i32_0, %c0_i32_1 : i32, i32, i32
  }
  func.func @transform_12(%arg0: i32) -> (i32, i32, i32) {
    %c0_i32 = arith.constant 0 : i32
    %c0_i32_0 = arith.constant 0 : i32
    %c0_i32_1 = arith.constant 0 : i32
    %c0_i32_2 = arith.constant 0 : i32
    return %c0_i32, %c0_i32_0, %c0_i32_1 : i32, i32, i32
  }
  func.func @transform_13(%arg0: i32) -> (i32, i32, i32) {
    %c0_i32 = arith.constant 0 : i32
    %c0_i32_0 = arith.constant 0 : i32
    %c0_i32_1 = arith.constant 0 : i32
    %c0_i32_2 = arith.constant 0 : i32
    return %c0_i32, %c0_i32_0, %c0_i32_1 : i32, i32, i32
  }
  func.func @transform_14(%arg0: i32) -> (i32, i32, i32) {
    %c0_i32 = arith.constant 0 : i32
    %c0_i32_0 = arith.constant 0 : i32
    %c0_i32_1 = arith.constant 0 : i32
    %c0_i32_2 = arith.constant 0 : i32
    return %c0_i32, %c0_i32_0, %c0_i32_1 : i32, i32, i32
  }
  func.func @transform_15(%arg0: i32) -> (i32, i32, i32) {
    %c0_i32 = arith.constant 0 : i32
    %c0_i32_0 = arith.constant 0 : i32
    %c0_i32_1 = arith.constant 0 : i32
    %c0_i32_2 = arith.constant 0 : i32
    return %c0_i32, %c0_i32_0, %c0_i32_1 : i32, i32, i32
  }
  func.func @transform_16(%arg0: i32) -> (i32, i32) {
    %c0_i32 = arith.constant 0 : i32
    %c0_i32_0 = arith.constant 0 : i32
    %c0_i32_1 = arith.constant 0 : i32
    return %c0_i32, %c0_i32_0 : i32, i32
  }
  func.func @transform_17(%arg0: i32) -> (i32, i32) {
    %c0_i32 = arith.constant 0 : i32
    %c0_i32_0 = arith.constant 0 : i32
    %c0_i32_1 = arith.constant 0 : i32
    return %c0_i32, %c0_i32_0 : i32, i32
  }
  func.func @transform_18(%arg0: i32) -> (i32, i32) {
    %c0_i32 = arith.constant 0 : i32
    %c0_i32_0 = arith.constant 0 : i32
    %c0_i32_1 = arith.constant 0 : i32
    return %c0_i32, %c0_i32_0 : i32, i32
  }
  func.func @transform_19(%arg0: i32) -> (i32, i32) {
    %c0_i32 = arith.constant 0 : i32
    %c0_i32_0 = arith.constant 0 : i32
    %c0_i32_1 = arith.constant 0 : i32
    return %c0_i32, %c0_i32_0 : i32, i32
  }
  func.func @transform_20(%arg0: i32) -> (i32, i32, i32) {
    %c0_i32 = arith.constant 0 : i32
    %c0_i32_0 = arith.constant 0 : i32
    %c0_i32_1 = arith.constant 0 : i32
    return %arg0, %c0_i32, %c0_i32_0 : i32, i32, i32
  }
}

</mosaic_0001>

<bundles_post_ra>
// kernel: run.1
= control target key start
LH: loop header
LB: loop body
LE: loop exit
PB: predicated region body
PF: predicated region fallthrough
CT: control target
= control target key end

     0   :  { %s6060_s0 = inlined_call_operand.vmem [shape: f32[2,8,128], index: 0, kind: input, shape index: {}]   ;;  %s6061_s1 = inlined_call_operand.vmem [shape: f32[2,1,8], index: 1, kind: input, shape index: {}]   ;;  %s6062_s2 = inlined_call_operand.vmem [shape: f32[1,128], index: 2, kind: input, shape index: {}]   ;;  %s6063_s3 = inlined_call_operand.vmem [shape: f32[1,128], index: 3, kind: input, shape index: {}]   ;;  %s6064_s4 = inlined_call_operand.hbm [shape: bf16[2,128,384], index: 4, kind: input, shape index: {}]   ;;  %s6065_s5 = inlined_call_operand.vmem [shape: f32[2,1,384], index: 5, kind: input, shape index: {}]   ;;  %s6066_s6 = inlined_call_operand.vmem [shape: bf16[2,128,128], index: 6, kind: input, shape index: {}]   ;;  %s6067_s7 = inlined_call_operand.vmem [shape: f32[2,1,128], index: 7, kind: input, shape index: {}]   ;;  %s6068_s8 = inlined_call_operand.hbm [shape: f32[2,1,128], index: 8, kind: input, shape index: {}]   ;;  %s6069_s9 = inlined_call_operand.hbm [shape: f32[2,1,128], index: 9, kind: input, shape index: {}]   ;;  %s6070_s10 = inlined_call_operand.hbm [shape: bf16[2,128,256], index: 10, kind: input, shape index: {}]   ;;  %s6071_s11 = inlined_call_operand.vmem [shape: f32[2,1,256], index: 11, kind: input, shape index: {}]   ;;  %s6072_s12 = inlined_call_operand.hbm [shape: bf16[2,256,128], index: 12, kind: input, shape index: {}]   ;;  %s6073_s13 = inlined_call_operand.vmem [shape: f32[2,1,128], index: 13, kind: input, shape index: {}]   ;;  %s6074_s14 = inlined_call_operand.hbm [shape: f32[2,1,128], index: 14, kind: input, shape index: {}]   ;;  %s6075_s15 = inlined_call_operand.hbm [shape: f32[2,1,128], index: 15, kind: input, shape index: {}]   ;;  %s6076_s16 = inlined_call_operand.vmem [shape: bf16[128,128], index: 16, kind: input, shape index: {}]   ;;  %s6077_s17 = inlined_call_operand.hbm [shape: f32[1,128], index: 17, kind: input, shape index: {}]   ;;  %s6078_s18 = inlined_call_operand.vmem [shape: bf16[128,128], index: 18, kind: input, shape index: {}]   ;;  %s6079_s19 = inlined_call_operand.hbm [shape: f32[1,128], index: 19, kind: input, shape index: {}]   ;;  %s6080_s20 = inlined_call_operand.vmem [shape: f32[2,8,128], index: 20, kind: output, shape index: {}]  }
   0x1   :  { %6091 = sst [smem:[#allocation22_spill]] %s6060_s0 }
   0x2   :  { %6092 = sst [smem:[#allocation23_spill]] %s6061_s1 }
   0x3   :  { %6093 = sst [smem:[#allocation24_spill]] %s6062_s2 }
   0x4   :  { %6094 = sst [smem:[#allocation25_spill]] %s6063_s3 }
   0x5   :  { %6095 = sst [smem:[#allocation26_spill]] %s6064_s4 }
   0x6   :  { %6096 = sst [smem:[#allocation27_spill]] %s6068_s8 }
   0x7   :  { %6097 = sst [smem:[#allocation28_spill]] %s6070_s10 }
   0x8   :  { %6098 = sst [smem:[#allocation29_spill]] %s6074_s14 }
   0x9   :  { %6099 = sst [smem:[#allocation30_spill]] %s6076_s16 }
   0xa   :  { %6100 = sst [smem:[#allocation31_spill]] %s6078_s18 }
   0xb   :  { %6101 = sst [smem:[#allocation32_spill]] %s6080_s20 }
   0xc   :  { %25 = vsyncpa [#allocation3], 0 }
   0xd   :  { %26 = vsyncpa [#allocation5], 0 }
   0xe   :  { %27 = vsyncpa [#allocation8], 0 }
   0xf   :  { %28 = vsyncpa [#allocation11], 0 }
  0x10   :  { %29 = vsyncpa [#allocation14], 0  ;;  %s5392_s1 = smov 0  }
  0x11 LB: > { %6102 = sst [smem:[#allocation21_spill]] %s5262_s1  ;;  %s5264_s22 = smov [#allocation4]   ;;  %s5262_s1 = sphi %s5392_s1, %s35_s1  }
  0x12   : > { %s536_s23 = sshll.u32 %s5264_s22, 4  ;;  %s5398_s24 = sadd.s32 4294967295, %s5262_s1   ;;  %s5403_s23 = int_to_ptr.vmem [resolvable:$true] %s536_s23 }
  0x13   : > { %p4083_p0 = scmp.ge.s32.totalorder %s5262_s1, 1  ;;  %p496_p1 = scmp.lt.s32.totalorder %s5262_s1, 3 }
  0x14   : > { %p6089_p2 = scmp.eq.s32.totalorder %s5398_s24, 0  ;;  %s5265_s25 = smov [#allocation7]  }
  0x15   : > { %p5405_p3 = pnand %p4083_p0, %p496_p1  ;;  %s562_s3 = sshll.u32 %s5265_s25, 4  ;;  %s5411_s3 = int_to_ptr.vmem [resolvable:$true] %s562_s3 }
  0x16   : > { %s5266_s27 = smov [#allocation10]   ;;  %s6105_s8 = sld [smem:[#allocation27_spill]] }
  0x17   : > { %s6103_s2 = scalar_select %p5405_p3, 1, 0 }
  0x18   : > { %p4679_p4 = pneg %p5405_p3  ;;  %s5419_s28 = sshll.u32 %s5266_s27, 4  ;;  %s595_s28 = int_to_ptr.vmem [resolvable:$true] %s5419_s28 }
  0x1a   : > { %p5415_p5 = pnand %p6089_p2, %p4679_p4 }
  0x1c   : > { %s4984_s30 = scalar_lea.hbm %s6105_s8, 32  ;;  %p5429_p7 = pneg %p5415_p5 }
  0x1d   : > { %p4985_p6 = scmp.ne.s32.totalorder %s6105_s8, %s4984_s30  ;;  %p4991_p10 = scmp.lt.u32.totalorder %s4984_s30, %s6105_s8 }
  0x1f   : > { %p4987_p8 = pnand %p5429_p7, %p4985_p6 }
  0x21   : > { %p4988_p9 = pneg %p4987_p8 }
  0x23   : > { %p4993_p11 = pnand %p4991_p10, %p4988_p9 }
  0x25   : > { %4996 = shalt.err (!%p4993_p11)
}
  0x26   : > { %s4997_s4 = scalar_lea.vmem %s5403_s23, 32  ;;  %p5005_p1 = scmp.lt.s32.totalorder %s5403_s23, %s5403_s23 }
  0x27   : > { %p4998_p12 = scmp.ne.s32.totalorder %s5403_s23, %s4997_s4  ;;  %p5006_p4 = scmp.lt.s32.totalorder %s4997_s4, %s4997_s4 }
  0x29   : > { %p5000_p13 = pnand %p4998_p12, %p5429_p7  ;;  %p5007_p6 = por %p5006_p4, %p5005_p1 }
  0x2b   : > { %p5001_p0 = pneg %p5000_p13 }
  0x2d   : > { %p5008_p8 = pnand %p5007_p6, %p5001_p0 }
  0x2f   : > { %5011 = shalt.err (!%p5008_p8)
}
  0x30   : > { %s6085_s29 = smov 16   ;;  %s6087_s30 = smov 1  }
  0x31   : > { %4685 = dma.hbm_to_vmem [thread:$0]  (!%p5415_p5), %s6105_s8, 32, %s5403_s23, [#allocation5], %s6085_s29, %s6085_s29, %s6087_s30  }
  0x32   : > { %s6107_s10 = sld [smem:[#allocation28_spill]] }
  0x38   : > { %s5012_s4 = scalar_lea.hbm %s6107_s10, 4096 }
  0x39   : > { %p5013_p9 = scmp.ne.s32.totalorder %s6107_s10, %s5012_s4  ;;  %p5019_p12 = scmp.lt.u32.totalorder %s5012_s4, %s6107_s10 }
  0x3b   : > { %p5015_p10 = pnand %p5013_p9, %p5429_p7 }
  0x3d   : > { %p5016_p11 = pneg %p5015_p10 }
  0x3f   : > { %p5021_p13 = pnand %p5019_p12, %p5016_p11 }
  0x41   : > { %5024 = shalt.err (!%p5021_p13)
}
  0x42   : > { %s5025_s23 = scalar_lea.vmem %s5411_s3, 4096  ;;  %p5033_p6 = scmp.lt.s32.totalorder %s5411_s3, %s5411_s3 }
  0x43   : > { %p5026_p0 = scmp.ne.s32.totalorder %s5411_s3, %s5025_s23  ;;  %p5034_p8 = scmp.lt.s32.totalorder %s5025_s23, %s5025_s23 }
  0x45   : > { %p5028_p1 = pnand %p5026_p0, %p5429_p7  ;;  %p5035_p9 = por %p5034_p8, %p5033_p6 }
  0x47   : > { %p5029_p4 = pneg %p5028_p1 }
  0x49   : > { %p5036_p10 = pnand %p5035_p9, %p5029_p4 }
  0x4b   : > { %5039 = shalt.err (!%p5036_p10)
}
  0x4c   : > { %s5269_s20 = smov 128   ;;  %s5270_s16 = smov 8  }
  0x4d   : > { %4691 = dma.hbm_to_vmem [thread:$0]  (!%p5415_p5), %s6107_s10, 4096, %s5411_s3, [#allocation8], %s5269_s20, %s5269_s20, %s5270_s16  }
  0x4e   : > { %s5271_s0 = smov [#allocation13]   ;;  %s6108_s14 = sld [smem:[#allocation29_spill]] }
  0x4f   : > { %s624_s21 = sshll.u32 %s5271_s0, 4  ;;  %s625_s21 = int_to_ptr.vmem [resolvable:$true] %s624_s21 }
  0x54   : > { %s5040_s4 = scalar_lea.hbm %s6108_s14, 32 }
  0x55   : > { %p5041_p11 = scmp.ne.s32.totalorder %s6108_s14, %s5040_s4  ;;  %p5047_p0 = scmp.lt.u32.totalorder %s5040_s4, %s6108_s14 }
  0x57   : > { %p5043_p12 = pnand %p5041_p11, %p5429_p7 }
  0x59   : > { %p5044_p13 = pneg %p5043_p12 }
  0x5b   : > { %p5049_p1 = pnand %p5047_p0, %p5044_p13 }
  0x5d   : > { %5052 = shalt.err (!%p5049_p1)
}
  0x5e   : > { %s5053_s3 = scalar_lea.vmem %s595_s28, 32  ;;  %p5061_p9 = scmp.lt.s32.totalorder %s595_s28, %s595_s28 }
  0x5f   : > { %p5054_p4 = scmp.ne.s32.totalorder %s595_s28, %s5053_s3  ;;  %p5062_p10 = scmp.lt.s32.totalorder %s5053_s3, %s5053_s3 }
  0x61   : > { %p5056_p6 = pnand %p5054_p4, %p5429_p7  ;;  %p5063_p2 = por %p5062_p10, %p5061_p9 }
  0x63   : > { %p5057_p8 = pneg %p5056_p6 }
  0x65   : > { %p5064_p3 = pnand %p5063_p2, %p5057_p8 }
  0x67   : > { %5067 = shalt.err (!%p5064_p3)
}
  0x68   : > { %s6109_s29 = smov 1   ;;  %s6110_s20 = smov 16  }
  0x69   : > { %4697 = dma.hbm_to_vmem [thread:$0]  (!%p5415_p5), %s6108_s14, 32, %s595_s28, [#allocation11], %s6110_s20, %s6110_s20, %s6109_s29  }
  0x6a   : > { %s5068_s1 = scalar_lea.hbm %s6077_s17, 16 }
  0x6b   : > { %p5069_p2 = scmp.ne.s32.totalorder %s6077_s17, %s5068_s1  ;;  %p5075_p12 = scmp.lt.u32.totalorder %s5068_s1, %s6077_s17 }
  0x6d   : > { %p5071_p3 = pnand %p5069_p2, %p5429_p7 }
  0x6f   : > { %p5072_p11 = pneg %p5071_p3 }
  0x71   : > { %p5077_p13 = pnand %p5075_p12, %p5072_p11 }
  0x73   : > { %5080 = shalt.err (!%p5077_p13)
}
  0x74   : > { %s5081_s23 = scalar_lea.vmem %s625_s21, 16  ;;  %s5088_s28 = scalar_lea.vmem %s625_s21, 32 }
  0x75   : > { %p5082_p0 = scmp.ne.s32.totalorder %s625_s21, %s5081_s23  ;;  %p5089_p6 = scmp.lt.s32.totalorder %s625_s21, %s625_s21 }
  0x76   : > { %p5090_p8 = scmp.lt.s32.totalorder %s5088_s28, %s5081_s23 }
  0x77   : > { %p5084_p1 = pnand %p5082_p0, %p5429_p7 }
  0x78   : > { %p5091_p9 = por %p5090_p8, %p5089_p6 }
  0x79   : > { %p5085_p4 = pneg %p5084_p1 }
  0x7b   : > { %p5092_p10 = pnand %p5091_p9, %p5085_p4 }
  0x7d   : > { %5095 = shalt.err (!%p5092_p10)
}
  0x7e   : > { %4703 = dma.hbm_to_vmem [thread:$0]  (!%p5415_p5), %s6077_s17, 16, %s625_s21, [#allocation14]  }
  0x7f   : > { %s5272_s30 = smov [#allocation2]   ;;  %s6111_s0 = sld [smem:[#allocation26_spill]] }
  0x80   : > { %s514_s16 = sshll.u32 %s5272_s30, 4  ;;  %s515_s16 = int_to_ptr.vmem [resolvable:$true] %s514_s16 }
  0x85   : > { %s5096_s25 = scalar_lea.hbm %s6111_s0, 6144 }
  0x86   : > { %p5097_p2 = scmp.ne.s32.totalorder %s6111_s0, %s5096_s25  ;;  %p5103_p12 = scmp.lt.u32.totalorder %s5096_s25, %s6111_s0 }
  0x88   : > { %p5099_p3 = pnand %p5097_p2, %p5429_p7 }
  0x8a   : > { %p5100_p11 = pneg %p5099_p3 }
  0x8c   : > { %p5105_p13 = pnand %p5103_p12, %p5100_p11 }
  0x8e   : > { %5108 = shalt.err (!%p5105_p13)
}
  0x8f   : > { %s5109_s21 = scalar_lea.vmem %s515_s16, 6144  ;;  %p5117_p6 = scmp.lt.s32.totalorder %s515_s16, %s515_s16 }
  0x90   : > { %p5110_p0 = scmp.ne.s32.totalorder %s515_s16, %s5109_s21  ;;  %p5118_p8 = scmp.lt.s32.totalorder %s5109_s21, %s5109_s21 }
  0x92   : > { %p5112_p1 = pnand %p5110_p0, %p5429_p7  ;;  %p5119_p9 = por %p5118_p8, %p5117_p6 }
  0x94   : > { %p5113_p4 = pneg %p5112_p1 }
  0x96   : > { %p5120_p10 = pnand %p5119_p9, %p5113_p4 }
  0x98   : > { %5123 = shalt.err (!%p5120_p10)
}
  0x99   : > { %s5273_s3 = smov 192   ;;  %s5274_s8 = smov 12  }
  0x9a   : > { %4682 = dma.hbm_to_vmem [thread:$0]  (!%p5415_p5), %s6111_s0, 6144, %s515_s16, [#allocation3], %s5273_s3, %s5273_s3, %s5274_s8  }
  0x9b   : > { %s5275_s1 = smov [#allocation6]   ;;  %s5276_s27 = smov [#allocation9]  }
  0x9c   : > { %s549_s25 = sshll.u32 %s5275_s1, 4  ;;  %s578_s4 = sshll.u32 %s5276_s27, 4  ;;  %s550_s25 = int_to_ptr.vmem [resolvable:$true] %s549_s25  ;;  %s5534_s4 = int_to_ptr.vmem [resolvable:$true] %s578_s4 }
  0x9d   : > { %s5124_s21 = scalar_lea.hbm %s6069_s9, 32 }
  0x9e   : > { %p5125_p2 = scmp.ne.s32.totalorder %s6069_s9, %s5124_s21  ;;  %p5131_p12 = scmp.lt.u32.totalorder %s5124_s21, %s6069_s9 }
  0xa0   : > { %p5127_p3 = pnand %p5125_p2, %p5429_p7 }
  0xa2   : > { %p5128_p11 = pneg %p5127_p3 }
  0xa4   : > { %p5133_p13 = pnand %p5131_p12, %p5128_p11 }
  0xa6   : > { %5136 = shalt.err (!%p5133_p13)
}
  0xa7   : > { %s5137_s3 = scalar_lea.vmem %s550_s25, 32  ;;  %p5145_p6 = scmp.lt.s32.totalorder %s550_s25, %s550_s25 }
  0xa8   : > { %p5138_p0 = scmp.ne.s32.totalorder %s550_s25, %s5137_s3  ;;  %p5146_p8 = scmp.lt.s32.totalorder %s5137_s3, %s5137_s3 }
  0xaa   : > { %p5140_p1 = pnand %p5138_p0, %p5429_p7  ;;  %p5147_p9 = por %p5146_p8, %p5145_p6 }
  0xac   : > { %p5141_p4 = pneg %p5140_p1 }
  0xae   : > { %p5148_p10 = pnand %p5147_p9, %p5141_p4 }
  0xb0   : > { %5151 = shalt.err (!%p5148_p10)
}
  0xb1   : > { %4688 = dma.hbm_to_vmem [thread:$0]  (!%p5415_p5), %s6069_s9, 32, %s550_s25, [#allocation5], %s6110_s20, %s6110_s20, %s6109_s29  }
  0xb2   : > { %s5152_s1 = scalar_lea.hbm %s6072_s12, 4096 }
  0xb3   : > { %p5153_p2 = scmp.ne.s32.totalorder %s6072_s12, %s5152_s1  ;;  %p5159_p12 = scmp.lt.u32.totalorder %s5152_s1, %s6072_s12 }
  0xb5   : > { %p5155_p3 = pnand %p5153_p2, %p5429_p7 }
  0xb7   : > { %p5156_p11 = pneg %p5155_p3 }
  0xb9   : > { %p5161_p13 = pnand %p5159_p12, %p5156_p11 }
  0xbb   : > { %5164 = shalt.err (!%p5161_p13)
}
  0xbc   : > { %s5165_s25 = scalar_lea.vmem %s5534_s4, 4096  ;;  %p5173_p6 = scmp.lt.s32.totalorder %s5534_s4, %s5534_s4 }
  0xbd   : > { %p5166_p0 = scmp.ne.s32.totalorder %s5534_s4, %s5165_s25  ;;  %p5174_p8 = scmp.lt.s32.totalorder %s5165_s25, %s5165_s25 }
  0xbf   : > { %p5168_p1 = pnand %p5166_p0, %p5429_p7  ;;  %p5175_p9 = por %p5174_p8, %p5173_p6 }
  0xc1   : > { %p5169_p4 = pneg %p5168_p1 }
  0xc3   : > { %p5176_p10 = pnand %p5175_p9, %p5169_p4 }
  0xc5   : > { %5179 = shalt.err (!%p5176_p10)
}
  0xc6   : > { %s5277_s30 = smov 64   ;;  %s5278_s16 = smov 4  }
  0xc7   : > { %4694 = dma.hbm_to_vmem [thread:$0]  (!%p5415_p5), %s6072_s12, 4096, %s5534_s4, [#allocation8], %s5277_s30, %s5277_s30, %s5278_s16  }
  0xc8   : > { %s5279_s14 = smov [#allocation12]   ;;  %s5280_s18 = smov [#allocation15]  }
  0xc9   : > { %s607_s8 = sshll.u32 %s5279_s14, 4  ;;  %s638_s1 = sshll.u32 %s5280_s18, 4  ;;  %s608_s8 = int_to_ptr.vmem [resolvable:$true] %s607_s8  ;;  %s5580_s1 = int_to_ptr.vmem [resolvable:$true] %s638_s1 }
  0xca   : > { %s5180_s28 = scalar_lea.hbm %s6075_s15, 32 }
  0xcb   : > { %p5181_p2 = scmp.ne.s32.totalorder %s6075_s15, %s5180_s28  ;;  %p5187_p12 = scmp.lt.u32.totalorder %s5180_s28, %s6075_s15 }
  0xcd   : > { %p5183_p3 = pnand %p5181_p2, %p5429_p7 }
  0xcf   : > { %p5184_p11 = pneg %p5183_p3 }
  0xd1   : > { %p5189_p13 = pnand %p5187_p12, %p5184_p11 }
  0xd3   : > { %5192 = shalt.err (!%p5189_p13)
}
  0xd4   : > { %s5193_s30 = scalar_lea.vmem %s608_s8, 32  ;;  %p5201_p6 = scmp.lt.s32.totalorder %s608_s8, %s608_s8 }
  0xd5   : > { %p5194_p0 = scmp.ne.s32.totalorder %s608_s8, %s5193_s30  ;;  %p5202_p8 = scmp.lt.s32.totalorder %s5193_s30, %s5193_s30 }
  0xd7   : > { %p5196_p1 = pnand %p5194_p0, %p5429_p7  ;;  %p5203_p9 = por %p5202_p8, %p5201_p6 }
  0xd9   : > { %p5197_p4 = pneg %p5196_p1 }
  0xdb   : > { %p5204_p10 = pnand %p5203_p9, %p5197_p4 }
  0xdd   : > { %5207 = shalt.err (!%p5204_p10)
}
  0xde   : > { %4700 = dma.hbm_to_vmem [thread:$0]  (!%p5415_p5), %s6075_s15, 32, %s608_s8, [#allocation11], %s6110_s20, %s6110_s20, %s6109_s29  }
  0xdf   : > { %s5208_s27 = scalar_lea.hbm %s6079_s19, 16 }
  0xe0   : > { %p5209_p2 = scmp.ne.s32.totalorder %s6079_s19, %s5208_s27  ;;  %p5215_p12 = scmp.lt.u32.totalorder %s5208_s27, %s6079_s19 }
  0xe2   : > { %p5211_p3 = pnand %p5209_p2, %p5429_p7 }
  0xe4   : > { %p5212_p11 = pneg %p5211_p3 }
  0xe6   : > { %p5217_p13 = pnand %p5215_p12, %p5212_p11 }
  0xe8   : > { %5220 = shalt.err (!%p5217_p13)
}
  0xe9   : > { %s5221_s29 = scalar_lea.vmem %s5580_s1, 16  ;;  %s5228_s20 = scalar_lea.vmem %s5580_s1, 32 }
  0xea   : > { %p5222_p0 = scmp.ne.s32.totalorder %s5580_s1, %s5221_s29  ;;  %p5229_p6 = scmp.lt.s32.totalorder %s5580_s1, %s5580_s1 }
  0xeb   : > { %p5230_p8 = scmp.lt.s32.totalorder %s5228_s20, %s5221_s29 }
  0xec   : > { %p5224_p1 = pnand %p5222_p0, %p5429_p7 }
  0xed   : > { %p5231_p9 = por %p5230_p8, %p5229_p6 }
  0xee   : > { %p5225_p4 = pneg %p5224_p1 }
  0xf0   : > { %p5232_p10 = pnand %p5231_p9, %p5225_p4 }
  0xf2   : > { %5235 = shalt.err (!%p5232_p10)
}
  0xf3   : > { %4706 = dma.hbm_to_vmem [thread:$0]  (!%p5415_p5), %s6079_s19, 16, %s5580_s1, [#allocation14]  }
  0xf4   : > { %p6112_p2 = scmp.ne.s32.totalorder %s6103_s2, 0 }
  0xf5   : > { %p6113_p7 = scmp.eq.s32.totalorder (!%p6112_p2), %s5398_s24, 0 }
  0xf6   : > { %664 = sbr.rel (%p6112_p2) target bundleno = 8454 (0x2106), region = 100 }
  0xfd   : > { %5241 = dma.done.wait (%p6113_p7), [#allocation3], 6144   ;;  %p6114_p3 = pmov %p6113_p7 }
  0xff   : > { %5243 = vsyncadd (%p6114_p3), [#allocation3], 4294961152  ;;  %p6115_p11 = pmov %p6114_p3 }
 0x100   : > { %p6116_p12 = pmov %p6114_p3 }
 0x101   : > { %5245 = dma.done.wait (%p6115_p11), [#allocation5], 64  }
 0x102   : > { %5247 = vsyncadd (%p6116_p12), [#allocation5], 4294967232  ;;  %p6117_p13 = pmov %p6114_p3 }
 0x103   : > { %p6118_p5 = pmov %p6114_p3 }
 0x104   : > { %5249 = dma.done.wait (%p6117_p13), [#allocation8], 8192  }
 0x105   : > { %5251 = vsyncadd (%p6118_p5), [#allocation8], 4294959104  ;;  %p6119_p0 = pmov %p6114_p3 }
 0x107   : > { %5253 = dma.done.wait (%p6119_p0), [#allocation11], 64   ;;  %p6120_p1 = pmov %p6119_p0 }
 0x108   : > { %p6121_p4 = pmov %p6119_p0 }
 0x109   : > { %5255 = vsyncadd (%p6120_p1), [#allocation11], 4294967232 }
 0x10a   : > { %5257 = dma.done.wait (%p6121_p4), [#allocation14], 32   ;;  %p6122_p6 = pmov %p6119_p0 }
 0x10b   : > { %p755_p8 = scmp.lt.s32.totalorder %s5398_s24, 1  ;;  %s6123_s1 = sld [smem:[#allocation22_spill]]  ;;  %v4756_v1 = vld [vmem:[#allocation2 + $0x4] ss:$12 sps:$4 sm:$0xff]   ;;  %v4758_v2 = vld [vmem:[#allocation2] ss:$12 sps:$4 sm:$0xff]   ;;  %v838_v41 = vlaneseq }
 0x10c   : > { %5259 = vsyncadd (%p6122_p6), [#allocation14], 4294967264  ;;  %v5281_v3 = vmov 0.0   ;;  %v4759_v4 = vld [vmem:[#allocation2 + $0x8] ss:$12 sps:$4 sm:$0xff]   ;;  %981 = vmatprep.subr.bf16.mxu0 %v4756_v1  ;;  %v5282_v25 = vmov 0  }
 0x10d   : > { %s6132_s24 = smov (!%p755_p8, %s5398_s24), 1  ;;  %4443 = vmatprep.subr.bf16.mxu1 %v5281_v3  ;;  %v4760_v5 = vld [vmem:[#allocation2 + $0x1c] ss:$12 sps:$4 sm:$0xff]   ;;  %v4762_v6 = vld [vmem:[#allocation2 + $0x18] ss:$12 sps:$4 sm:$0xff]   ;;  %982 = vmatpush1.bf16.msra.mxu0 %v4758_v2  ;;  %vm5283_vm0 = vmmov 0  }
 0x10e   : > { %s4104_s2 = sshll.u32 %s6132_s24, 3  ;;  %v4763_v7 = vld [vmem:[#allocation2 + $0x20] ss:$12 sps:$4 sm:$0xff]   ;;  %4444 = vmatpush3.bf16.msra.mxu1 %v4759_v4  ;;  %983 = vmatprep.subr.bf16.mxu0 %v4760_v5  ;;  %v4766_v13 = vld [vmem:[#allocation2 + $0x30] ss:$12 sps:$4 sm:$0xff]   ;;  %s6124_s10 = sld [smem:[#allocation24_spill]] }
 0x10f   : > { %v4764_v8 = vld [vmem:[#allocation2 + $0x34] ss:$12 sps:$4 sm:$0xff]   ;;  %4445 = vmatprep.subr.bf16.mxu1 %v5281_v3  ;;  %v4767_v14 = vld [vmem:[#allocation2 + $0x38] ss:$12 sps:$4 sm:$0xff]   ;;  %v4771_v17 = vld [vmem:[#allocation2 + $0x50] ss:$12 sps:$4 sm:$0xff]   ;;  %1013 = vmatprep.mubr.bf16.mxu0 %v5282_v25 }
 0x110   : > { %v4768_v15 = vld [vmem:[#allocation2 + $0x4c] ss:$12 sps:$4 sm:$0xff]   ;;  %v4770_v16 = vld [vmem:[#allocation2 + $0x48] ss:$12 sps:$4 sm:$0xff]   ;;  %v4772_v18 = vld [vmem:[#allocation2 + $0x64] ss:$12 sps:$4 sm:$0xff]   ;;  %4459 = vmatprep.mubr.msk.bf16.mxu1 %vm5283_vm0, %v5281_v3 }
 0x111   : > { %s758_s4 = scalar_lea.vmem %s6123_s1, %s4104_s2  ;;  %984 = vmatpush1.bf16.msra.mxu0 %v4762_v6  ;;  %v4774_v19 = vld [vmem:[#allocation2 + $0x60] ss:$12 sps:$4 sm:$0xff]   ;;  %v4775_v20 = vld [vmem:[#allocation2 + $0x68] ss:$12 sps:$4 sm:$0xff]   ;;  %v4778_v22 = vld [vmem:[#allocation2 + $0x78] ss:$12 sps:$4 sm:$0xff]  }
 0x112   : > { %v767_v0 = vld [vmem:[%s758_s4] sm:$0xff]  ;;  %4446 = vmatpush3.bf16.msra.mxu1 %v4763_v7  ;;  %985 = vmatprep.subr.bf16.mxu0 %v4764_v8  ;;  %v4776_v21 = vld [vmem:[#allocation2 + $0x7c] ss:$12 sps:$4 sm:$0xff]   ;;  %v4784_v28 = vld [vmem:[#allocation2 + $0xac] ss:$12 sps:$4 sm:$0xff]   ;;  %s6125_s27 = sld [smem:[#allocation25_spill]] }
 0x113   : > { %770 = vadd.xlane.f32.xlu0 %v767_v0  ;;  %4447 = vmatprep.subr.bf16.mxu1 %v5281_v3  ;;  %v4779_v23 = vld [vmem:[#allocation2 + $0x80] ss:$12 sps:$4 sm:$0xff]   ;;  %v4782_v26 = vld [vmem:[#allocation2 + $0x90] ss:$12 sps:$4 sm:$0xff]   ;;  %v4783_v27 = vld [vmem:[#allocation2 + $0x98] ss:$12 sps:$4 sm:$0xff]  }
 0x114   : > { %v4780_v24 = vld [vmem:[#allocation2 + $0x94] ss:$12 sps:$4 sm:$0xff]   ;;  %v4787_v30 = vld [vmem:[#allocation2 + $0xb0] ss:$12 sps:$4 sm:$0xff]   ;;  %v5686_v42 = vshrl.u32 %v838_v41, 7  ;;  %vm1062_vm1 = vcmask 261120  }
 0x115   : > { %986 = vmatpush1.bf16.msra.mxu0 %v4766_v13  ;;  %v4786_v29 = vld [vmem:[#allocation2 + $0xa8] ss:$12 sps:$4 sm:$0xff]   ;;  %v4106_v35 = vld [vmem:[%s6124_s10] ss:$0 sm:$0xff]  ;;  %s5284_s21 = smov 96   ;;  %s6126_s20 = sld [smem:[#allocation23_spill]] }
 0x116   : > { %4448 = vmatpush3.bf16.msra.mxu1 %v4767_v14  ;;  %987 = vmatprep.subr.bf16.mxu0 %v4768_v15  ;;  %v5689_v43 = vsub.s32 1, %v5686_v42  ;;  %v836_v44 = vld [vmem:[%s6065_s5] sm:$0x7]  ;;  %v5695_v45 = vsub.s32 0, %v5686_v42  ;;  %v848_v46 = vsub.s32 2, %v5686_v42  ;;  %vm1139_vm2 = vcmask 64512  }
 0x117   : > { %4449 = vmatprep.subr.bf16.mxu1 %v5281_v3  ;;  %s5285_s3 = smov 64   ;;  %s5286_s26 = smov 32   ;;  %vm1733_vm3 = vcmask 523264   ;;  %vm1735_vm4 = vcmask 785408  }
 0x118   : > { %v4107_v37 = vld [vmem:[%s6125_s27] ss:$0 sm:$0xff]  ;;  %v845_v47 = vrot.slane %v836_v44, %v5689_v43  ;;  %v841_v50 = vrot.slane %v836_v44, %v5695_v45  ;;  %v849_v53 = vrot.slane %v836_v44, %v848_v46  ;;  %s6128_s29 = sld [smem:[#allocation31_spill]] }
 0x119   : > { %988 = vmatpush1.bf16.msra.mxu0 %v4770_v16 }
 0x11a   : > { %4450 = vmatpush3.bf16.msra.mxu1 %v4771_v17  ;;  %989 = vmatprep.subr.bf16.mxu0 %v4772_v18 }
 0x11b   : > { %4451 = vmatprep.subr.bf16.mxu1 %v5281_v3  ;;  %s761_s8 = scalar_lea.vmem %s6126_s20, %s6132_s24  ;;  %s6127_s20 = sld [smem:[#allocation30_spill]] }
 0x11c   : > { %v5716_v61 = vld [vmem:[%s761_s8] ss:$0 sm:$0xff]  ;;  %s6129_s8 = sld [smem:[#allocation32_spill]] }
 0x11d   : > { %990 = vmatpush1.bf16.msra.mxu0 %v4774_v19 }
 0x11e   : > { %4452 = vmatpush3.bf16.msra.mxu1 %v4775_v20  ;;  %991 = vmatprep.subr.bf16.mxu0 %v4776_v21 }
 0x11f   : > { %4453 = vmatprep.subr.bf16.mxu1 %v5281_v3 }
 0x121   : > { %992 = vmatpush1.bf16.msra.mxu0 %v4778_v22 }
 0x122   : > { %4454 = vmatpush3.bf16.msra.mxu1 %v4779_v23  ;;  %993 = vmatprep.subr.bf16.mxu0 %v4780_v24  ;;  %s765_s22 = scalar_lea.vmem %s6129_s8, %s4104_s2 }
 0x123   : > { %4455 = vmatprep.subr.bf16.mxu1 %v5281_v3 }
 0x125   : > { %994 = vmatpush1.bf16.msra.mxu0 %v4782_v26 }
 0x126   : > { %4456 = vmatpush3.bf16.msra.mxu1 %v4783_v27  ;;  %995 = vmatprep.subr.bf16.mxu0 %v4784_v28 }
 0x127   : > { %4457 = vmatprep.subr.bf16.mxu1 %v5281_v3 }
 0x129   : > { %996 = vmatpush1.bf16.msra.mxu0 %v4786_v29 }
 0x12a   : > { %4458 = vmatpush3.bf16.msra.mxu1 %v4787_v30  ;;  %4493 = vmatprep.subr.mxu0 %v5281_v3 }
 0x12b   : > { %4463 = vmatprep.subr.mxu1 %v5281_v3 }
 0x1a0   : > { %v771_v9 = vpop.xlane.xlu0 %770 }
 0x1a1   : > { %v773_v10 = vmul.f32 0.0078125, %v771_v9 }
 0x1a3   : > { %v774_v11 = vsub.f32 %v767_v0, %v773_v10 }
 0x1a5   : > { %v775_v12 = vmul.f32 %v774_v11, %v774_v11 }
 0x1a7   : > { %776 = vadd.xlane.f32.xlu0 %v775_v12 }
 0x234   : > { %v777_v31 = vpop.xlane.xlu0 %776 }
 0x235   : > { %v778_v32 = vmul.f32 0.0078125, %v777_v31 }
 0x237   : > { %v779_v33 = vadd.f32 1e-12, %v778_v32 }
 0x239   : > { %4932 = vrsqrt.f32 %v779_v33 }
 0x243   : > { %v4933_v34 = vpop.eup %4932 }
 0x244   : > { %v781_v36 = vmul.f32 %v4933_v34, %v774_v11 }
 0x246   : > { %v788_v38 = vmul.f32 %v4106_v35, %v781_v36 }
 0x248   : > { %v5678_v39 = vadd.f32 %v4107_v37, %v788_v38 }
 0x24a   : > { %v803_v40 = vpack.c.bf16 %v5678_v39, %v5678_v39 }
 0x24c   : > { %1014 = vmatmul.mubr.bf16.vlgmr.msra.gmra.mrb[0].mxu0 %v803_v40  ;;  %4460 = vmatmul.mubr.bf16.vlgmr.msra.gmra.mrb[0].mxu1 %v803_v40 }
 0x24d   : > { %4465 = vmatprep.mubr.msk.f32.mxu1 %vm5283_vm0, %v5281_v3  ;;  %4495 = vmatprep.mubr.msk.f32.mxu0 %vm5283_vm0, %v5281_v3 }
 0x31f   : > { %v1015_v48 = vpop.f32.mrb[0].mxu0  ;;  %v1056_v49 = vpop.f32.mrb[0].mxu1 }
 0x320   : > { %v1017_v51 = vpop.f32.mrb[1].mxu0  ;;  %v4461_v52 = vpop.f32.mrb[1].mxu1  ;;  %v1016_v59 = vadd.f32 %v1015_v48, %v841_v50  ;;  %v5705_v60 = vadd.f32 %v1056_v49, %v849_v53 }
 0x321   : > { %v1018_v54 = vadd.f32 %v1017_v51, %v845_v47  ;;  %v1019_v55 = vpop.f32.mrb[2].mxu0  ;;  %v1059_v56 = vpop.f32.mrb[2].mxu1 }
 0x322   : > { %v1020_v57 = vpop.f32.mrb[3].mxu0  ;;  %v4462_v58 = vpop.f32.mrb[3].mxu1 }
 0x323   : > { %1226 = vrot.lane.b32.xlu0 %v1018_v54, %s5284_s21  ;;  %4464 = vmatpush3.xpose.msk.msra.mxu1 %vm1062_vm1, %v1018_v54 }
 0x324   : > { %4468 = vmatprep.subr.mxu1 %v5281_v3 }
 0x326   : > { %4466 = vmatmul.mubr.msk.f32.vlgmr.msra.gmra.mrb[4].mxu1 %vm1062_vm1, %v1016_v59 }
 0x327   : > { %4469 = vmatpush3.msra.mxu1 %v5705_v60  ;;  %4470 = vmatprep.mubr.msk.f32.mxu1 %vm5283_vm0, %v5281_v3 }
 0x328   : > { %4473 = vmatprep.subr.mxu1 %v5281_v3 }
 0x395   : > { %v1227_v11 = vpop.permute.xlu0 %1226 }
 0x3f9   : > { %v1135_v62 = vpop.f32.mrb[4].mxu1 }
 0x3fa   : > { %v1136_v63 = vadd.f32 %v5716_v61, %v1135_v62  ;;  %v4467_v0 = vpop.f32.mrb[5].mxu1 }
 0x3fc   : > { %v1140_v1 = vsel %vm1139_vm2, %v1136_v63, -inf }
 0x3fd   : > { %1141 = vmax.xlane.f32.xlu1 %v1140_v1 }
 0x48a   : > { %v1142_v2 = vpop.xlane.xlu1 %1141 }
 0x48b   : > { %v1143_v4 = vsub.f32 %v1136_v63, %v1142_v2 }
 0x48d   : > { %v1144_v5 = vmul.f32 1.442695, %v1143_v4 }
 0x48f   : > { %4934 = vpow2.f32 %v1144_v5  ;;  %v4789_v5 = vld [vmem:[%s6066_s6 + $0x8] sm:$0xff]  }
 0x499   : > { %v4935_v6 = vpop.eup %4934 }
 0x49a   : > { %v1146_v7 = vsel %vm1139_vm2, %v4935_v6, 0.0 }
 0x49b   : > { %1147 = vadd.xlane.f32.xlu1 %v1146_v7  ;;  %v4791_v7 = vld [vmem:[%s6066_s6 + $0x18] sm:$0xff]  }
 0x4ac   : > { %1224 = vrot.lane.b32.xlu1 %v1016_v59, %s5284_s21 }
 0x528   : > { %v1148_v8 = vpop.xlane.xlu1 %1147 }
 0x529   : > { %4936 = vrcp.f32 %v1148_v8  ;;  %v4792_v8 = vld [vmem:[%s6066_s6 + $0x20] sm:$0xff]  }
 0x52c   : > { %v1225_v12 = vpop.permute.xlu1 %1224 }
 0x533   : > { %v4937_v9 = vpop.eup %4936 }
 0x534   : > { %v1150_v10 = vmul.f32 %v4937_v9, %v4935_v6  ;;  %v4790_v6 = vld [vmem:[%s6066_s6 + $0x10] sm:$0xff]   ;;  %v4793_v9 = vld [vmem:[%s6066_s6 + $0x28] sm:$0xff]  }
 0x536   : > { %4471 = vmatmul.mubr.msk.f32.vlgmr.msra.gmra.mrb[6].mxu1 %vm1139_vm2, %v1150_v10  ;;  %v4794_v10 = vld [vmem:[%s6066_s6 + $0x30] sm:$0xff]  }
 0x537   : > { %4474 = vmatpush3.xpose.msk.msra.mxu1 %vm1062_vm1, %v1227_v11  ;;  %4475 = vmatprep.mubr.msk.f32.mxu1 %vm5283_vm0, %v5281_v3  ;;  %v4795_v11 = vld [vmem:[%s6066_s6 + $0x38] sm:$0xff]  }
 0x538   : > { %4478 = vmatprep.subr.mxu1 %v5281_v3 }
 0x53a   : > { %4476 = vmatmul.mubr.msk.f32.vlgmr.msra.gmra.mrb[8].mxu1 %vm1062_vm1, %v1225_v12 }
 0x53b   : > { %4480 = vmatprep.mubr.msk.f32.mxu1 %vm5283_vm0, %v5281_v3 }
 0x609   : > { %v5730_v13 = vpop.f32.mrb[6].mxu1 }
 0x60a   : > { %v4472_v14 = vpop.f32.mrb[7].mxu1 }
 0x60d   : > { %v1298_v15 = vpop.f32.mrb[8].mxu1 }
 0x60e   : > { %v1299_v16 = vadd.f32 %v5716_v61, %v1298_v15  ;;  %v4477_v17 = vpop.f32.mrb[9].mxu1 }
 0x610   : > { %v1302_v18 = vsel %vm1139_vm2, %v1299_v16, -inf }
 0x611   : > { %1303 = vmax.xlane.f32.xlu1 %v1302_v18 }
 0x622   : > { %1392 = vrot.lane.b32.xlu1 %v1018_v54, %s5285_s3 }
 0x626   : > { %1390 = vrot.lane.b32.xlu1 %v1016_v59, %s5285_s3 }
 0x62a   : > { %1557 = vrot.lane.b32.xlu1 %v1018_v54, %s5286_s26 }
 0x69e   : > { %v1304_v19 = vpop.xlane.xlu1 %1303 }
 0x69f   : > { %v1305_v20 = vsub.f32 %v1299_v16, %v1304_v19 }
 0x6a1   : > { %v1306_v21 = vmul.f32 1.442695, %v1305_v20 }
 0x6a2   : > { %v1393_v22 = vpop.permute.xlu1 %1392 }
 0x6a3   : > { %4938 = vpow2.f32 %v1306_v21 }
 0x6a6   : > { %v1391_v23 = vpop.permute.xlu1 %1390 }
 0x6aa   : > { %v1558_v24 = vpop.permute.xlu1 %1557 }
 0x6ab   : > { %4494 = vmatpush3.xpose.msk.msra.mxu0 %vm1062_vm1, %v1558_v24  ;;  %v4145_v24 = vld [vmem:[%s6067_s7] ss:$0 sm:$0xff] }
 0x6ac   : > { %4503 = vmatprep.subr.bf16.mxu0 %v5281_v3 }
 0x6ad   : > { %v4939_v26 = vpop.eup %4938 }
 0x6ae   : > { %v1308_v27 = vsel %vm1139_vm2, %v4939_v26, 0.0 }
 0x6af   : > { %1309 = vadd.xlane.f32.xlu0 %v1308_v27 }
 0x6c5   : > { %1314 = vrot.lane.b32.xlu0 %v5705_v60, %s5284_s21 }
 0x6c9   : > { %1555 = vrot.lane.b32.xlu0 %v1016_v59, %s5286_s26 }
 0x73c   : > { %v1310_v28 = vpop.xlane.xlu0 %1309 }
 0x73d   : > { %4940 = vrcp.f32 %v1310_v28 }
 0x740   : > { %v1315_v29 = vpop.permute.xlu0 %1314 }
 0x741   : > { %4479 = vmatpush3.msra.mxu1 %v1315_v29 }
 0x742   : > { %4483 = vmatprep.subr.mxu1 %v5281_v3 }
 0x744   : > { %v1556_v30 = vpop.permute.xlu0 %1555 }
 0x745   : > { %4496 = vmatmul.mubr.msk.f32.vlgmr.msra.gmra.mrb[4].mxu0 %vm1062_vm1, %v1556_v30 }
 0x746   : > { %4519 = vmatprep.mubr.msk.bf16.mxu0 %vm5283_vm0, %v5281_v3 }
 0x747   : > { %v4941_v31 = vpop.eup %4940 }
 0x748   : > { %v1312_v32 = vmul.f32 %v4941_v31, %v4939_v26 }
 0x74a   : > { %4481 = vmatmul.mubr.msk.f32.vlgmr.msra.gmra.mrb[10].mxu1 %vm1139_vm2, %v1312_v32  ;;  %v4798_v32 = vld [vmem:[#allocation7 + $0x4] ss:$8 sps:$4 sm:$0xff]  }
 0x74b   : > { %4484 = vmatpush3.xpose.msk.msra.mxu1 %vm1062_vm1, %v1393_v22  ;;  %4485 = vmatprep.mubr.msk.f32.mxu1 %vm5283_vm0, %v5281_v3 }
 0x74c   : > { %4488 = vmatprep.subr.mxu1 %v5281_v3 }
 0x74e   : > { %4486 = vmatmul.mubr.msk.f32.vlgmr.msra.gmra.mrb[12].mxu1 %vm1062_vm1, %v1391_v23 }
 0x74f   : > { %4490 = vmatprep.mubr.msk.f32.mxu1 %vm5283_vm0, %v5281_v3 }
 0x818   : > { %v1629_v33 = vpop.f32.mrb[4].mxu0 }
 0x819   : > { %v1630_v34 = vadd.f32 %v5716_v61, %v1629_v33  ;;  %v4497_v35 = vpop.f32.mrb[5].mxu0  ;;  %v4801_v33 = vld [vmem:[#allocation7 + $0x14] ss:$8 sps:$4 sm:$0xff]  }
 0x81a   : > { %v4804_v35 = vld [vmem:[#allocation7 + $0x24] ss:$8 sps:$4 sm:$0xff]  }
 0x81b   : > { %v1633_v36 = vsel %vm1139_vm2, %v1630_v34, -inf }
 0x81c   : > { %1634 = vmax.xlane.f32.xlu0 %v1633_v36  ;;  %v4802_v36 = vld [vmem:[#allocation7 + $0x20] ss:$8 sps:$4 sm:$0xff]  }
 0x81d   : > { %v1386_v37 = vpop.f32.mrb[10].mxu1 }
 0x81e   : > { %v4482_v38 = vpop.f32.mrb[11].mxu1 }
 0x821   : > { %v1464_v40 = vpop.f32.mrb[12].mxu1 }
 0x822   : > { %v1465_v41 = vadd.f32 %v5716_v61, %v1464_v40  ;;  %v4487_v44 = vpop.f32.mrb[13].mxu1 }
 0x823   : > { %v4807_v44 = vld [vmem:[#allocation7 + $0x34] ss:$8 sps:$4 sm:$0xff]  }
 0x824   : > { %v1468_v47 = vsel %vm1139_vm2, %v1465_v41, -inf }
 0x825   : > { %1469 = vmax.xlane.f32.xlu1 %v1468_v47  ;;  %v4810_v47 = vld [vmem:[#allocation7 + $0x44] ss:$8 sps:$4 sm:$0xff]  }
 0x836   : > { %1479 = vrot.lane.b32.xlu1 %v5705_v60, %s5285_s3 }
 0x83a   : > { %1721 = vrot.lane.b32.xlu1 %v1386_v37, %s5286_s26 }
 0x8a9   : > { %v1635_v48 = vpop.xlane.xlu0 %1634 }
 0x8aa   : > { %v1636_v49 = vsub.f32 %v1630_v34, %v1635_v48  ;;  %v4799_v34 = vld [vmem:[#allocation7 + $0x10] ss:$8 sps:$4 sm:$0xff]   ;;  %v4808_v48 = vld [vmem:[#allocation7 + $0x40] ss:$8 sps:$4 sm:$0xff]  }
 0x8ac   : > { %v1637_v50 = vmul.f32 1.442695, %v1636_v49  ;;  %v4813_v49 = vld [vmem:[#allocation7 + $0x54] ss:$8 sps:$4 sm:$0xff]  }
 0x8ae   : > { %4942 = vpow2.f32 %v1637_v50  ;;  %v4811_v50 = vld [vmem:[#allocation7 + $0x50] ss:$8 sps:$4 sm:$0xff]  }
 0x8b2   : > { %v1470_v51 = vpop.xlane.xlu1 %1469 }
 0x8b3   : > { %v1471_v52 = vsub.f32 %v1465_v41, %v1470_v51  ;;  %v4816_v51 = vld [vmem:[#allocation7 + $0x64] ss:$8 sps:$4 sm:$0xff]  }
 0x8b5   : > { %v1472_v53 = vmul.f32 1.442695, %v1471_v52  ;;  %v4814_v52 = vld [vmem:[#allocation7 + $0x60] ss:$8 sps:$4 sm:$0xff]  }
 0x8b6   : > { %v1480_v54 = vpop.permute.xlu1 %1479 }
 0x8b7   : > { %4944 = vpow2.f32 %v1472_v53  ;;  %4489 = vmatpush3.msra.mxu1 %v1480_v54  ;;  %v4819_v53 = vld [vmem:[#allocation7 + $0x74] ss:$8 sps:$4 sm:$0xff]   ;;  %v4817_v54 = vld [vmem:[#allocation7 + $0x70] ss:$8 sps:$4 sm:$0xff]  }
 0x8b8   : > { %v4943_v55 = vpop.eup %4942  ;;  %4498 = vmatprep.subr.mxu1 %v5281_v3 }
 0x8b9   : > { %v1639_v56 = vsel %vm1139_vm2, %v4943_v55, 0.0 }
 0x8ba   : > { %1640 = vadd.xlane.f32.xlu0 %v1639_v56  ;;  %v1722_v17 = vpop.permute.xlu1 %1721 }
 0x8bb   : > { %v1732_v19 = vsel %vm1062_vm1, %v5730_v13, %v1722_v17  ;;  %v4796_v13 = vld [vmem:[#allocation7] ss:$8 sps:$4 sm:$0xff]   ;;  %v4833_v17 = vld [vmem:[#allocation9 + $0x30] sm:$0xff]  }
 0x8c1   : > { %v4945_v57 = vpop.eup %4944 }
 0x8c2   : > { %v1474_v58 = vsel %vm1139_vm2, %v4945_v57, 0.0 }
 0x8c3   : > { %1475 = vadd.xlane.f32.xlu0 %v1474_v58 }
 0x8d9   : > { %1644 = vrot.lane.b32.xlu0 %v5705_v60, %s5286_s26  ;;  %v4788_v60 = vld [vmem:[%s6066_s6] sm:$0xff]  }
 0x8da   : > { %4504 = vmatpush3.bf16.msra.mxu0 %v4788_v60  ;;  %v4821_v60 = vld [vmem:[#allocation9] sm:$0xff]  }
 0x8db   : > { %4505 = vmatprep.subr.bf16.mxu0 %v5281_v3 }
 0x8de   : > { %4506 = vmatpush3.bf16.msra.mxu0 %v4789_v5  ;;  %v4822_v5 = vld [vmem:[#allocation9 + $0x48] sm:$0xff]  }
 0x8df   : > { %4507 = vmatprep.subr.bf16.mxu0 %v5281_v3 }
 0x8e2   : > { %4508 = vmatpush3.bf16.msra.mxu0 %v4790_v6  ;;  %v4823_v6 = vld [vmem:[#allocation9 + $0x8] sm:$0xff]  }
 0x8e3   : > { %4509 = vmatprep.subr.bf16.mxu0 %v5281_v3 }
 0x8e6   : > { %4510 = vmatpush3.bf16.msra.mxu0 %v4791_v7  ;;  %v4824_v7 = vld [vmem:[#allocation9 + $0x50] sm:$0xff]  }
 0x8e7   : > { %4511 = vmatprep.subr.bf16.mxu0 %v5281_v3 }
 0x8ea   : > { %4512 = vmatpush3.bf16.msra.mxu0 %v4792_v8  ;;  %v4825_v8 = vld [vmem:[#allocation9 + $0x10] sm:$0xff]  }
 0x8eb   : > { %4513 = vmatprep.subr.bf16.mxu0 %v5281_v3 }
 0x8ee   : > { %4514 = vmatpush3.bf16.msra.mxu0 %v4793_v9  ;;  %v4826_v9 = vld [vmem:[#allocation9 + $0x58] sm:$0xff]  }
 0x8ef   : > { %4515 = vmatprep.subr.bf16.mxu0 %v5281_v3 }
 0x8f2   : > { %4516 = vmatpush3.bf16.msra.mxu0 %v4794_v10  ;;  %v4827_v10 = vld [vmem:[#allocation9 + $0x18] sm:$0xff]  }
 0x8f3   : > { %4517 = vmatprep.subr.bf16.mxu0 %v5281_v3 }
 0x8f6   : > { %4518 = vmatpush3.bf16.msra.mxu0 %v4795_v11  ;;  %v4828_v11 = vld [vmem:[#allocation9 + $0x60] sm:$0xff]  }
 0x947   : > { %v1641_v59 = vpop.xlane.xlu0 %1640 }
 0x950   : > { %v1476_v62 = vpop.xlane.xlu0 %1475 }
 0x951   : > { %4946 = vrcp.f32 %v1476_v62 }
 0x952   : > { %4948 = vrcp.f32 %v1641_v59  ;;  %v4154_v59 = vld [vmem:[#allocation4] ss:$0 sm:$0xff] }
 0x954   : > { %v1645_v2 = vpop.permute.xlu0 %1644 }
 0x95b   : > { %v4947_v63 = vpop.eup %4946 }
 0x95c   : > { %v1478_v0 = vmul.f32 %v4947_v63, %v4945_v57  ;;  %v4949_v1 = vpop.eup %4948  ;;  %v4155_v63 = vld [vmem:[#allocation6] ss:$0 sm:$0xff] }
 0x95d   : > { %v1643_v4 = vmul.f32 %v4949_v1, %v4943_v55 }
 0x95e   : > { %4491 = vmatmul.mubr.msk.f32.vlgmr.msra.gmra.mrb[14].mxu1 %vm1139_vm2, %v1478_v0 }
 0x95f   : > { %4499 = vmatpush3.msra.mxu1 %v1645_v2  ;;  %4500 = vmatprep.mubr.msk.f32.mxu1 %vm5283_vm0, %v5281_v3 }
 0x960   : > { %1986 = vmatprep.subr.bf16.mxu1 %v4798_v32 }
 0x962   : > { %4501 = vmatmul.mubr.msk.f32.vlgmr.msra.gmra.mrb[16].mxu1 %vm1139_vm2, %v1643_v4  ;;  %v4820_v4 = vld [vmem:[#allocation9 + $0x40] sm:$0xff]  }
 0x963   : > { %2018 = vmatprep.mubr.bf16.mxu1 %v5282_v25  ;;  %1987 = vmatpush1.bf16.msra.mxu1 %v4796_v13 }
 0x964   : > { %1988 = vmatprep.subr.bf16.mxu1 %v4801_v33  ;;  %4347 = vmatprep.subr.bf16.mxu0 %v4820_v4  ;;  %v4842_v4 = vld [vmem:[#allocation2 + $0xdc] ss:$12 sps:$4 sm:$0xff]  }
 0x967   : > { %1989 = vmatpush1.bf16.msra.mxu1 %v4799_v34 }
 0x968   : > { %1990 = vmatprep.subr.bf16.mxu1 %v4804_v35 }
 0x96b   : > { %1991 = vmatpush1.bf16.msra.mxu1 %v4802_v36 }
 0x96c   : > { %1992 = vmatprep.subr.bf16.mxu1 %v4807_v44 }
 0xa31   : > { %v1551_v12 = vpop.f32.mrb[14].mxu1 }
 0xa32   : > { %1725 = vrot.lane.b32.xlu1 %v1551_v12, %s5285_s3  ;;  %v4492_v14 = vpop.f32.mrb[15].mxu1  ;;  %v4829_v12 = vld [vmem:[#allocation9 + $0x20] sm:$0xff]  }
 0xa33   : > { %v4830_v14 = vld [vmem:[#allocation9 + $0x68] sm:$0xff]  }
 0xa35   : > { %v1716_v15 = vpop.f32.mrb[16].mxu1 }
 0xa36   : > { %1729 = vrot.lane.b32.xlu1 %v1716_v15, %s5284_s21  ;;  %v4502_v16 = vpop.f32.mrb[17].mxu1  ;;  %v4831_v15 = vld [vmem:[#allocation9 + $0x28] sm:$0xff]  }
 0xa37   : > { %v4832_v16 = vld [vmem:[#allocation9 + $0x70] sm:$0xff]  }
 0xaa4   : > { %v1726_v18 = vpop.permute.xlu1 %1725 }
 0xaa5   : > { %v1734_v20 = vsel %vm1733_vm3, %v1732_v19, %v1726_v18  ;;  %v4834_v18 = vld [vmem:[#allocation9 + $0x78] sm:$0xff]  }
 0xaa6   : > { %v4835_v19 = vld [vmem:[#allocation9 + $0x38] sm:$0xff]  }
 0xaa8   : > { %v1730_v21 = vpop.permute.xlu1 %1729 }
 0xaa9   : > { %v1736_v22 = vsel %vm1735_vm4, %v1734_v20, %v1730_v21  ;;  %v1894_v20 = vld [vmem:[%s6071_s11] sm:$0x3] }
 0xaaa   : > { %v1737_v23 = vpack.c.bf16 %v1736_v22, %v1736_v22  ;;  %v1899_v21 = vrot.slane %v1894_v20, %v5695_v45  ;;  %v1903_v22 = vrot.slane %v1894_v20, %v5689_v43  ;;  %v4856_v20 = vld [vmem:[#allocation2 + $0x138] ss:$12 sps:$4 sm:$0xff]  }
 0xaac   : > { %4520 = vmatmul.mubr.bf16.vlgmr.msra.gmra.mrb[8].mxu0 %v1737_v23 }
 0xaad   : > { %4348 = vmatpush3.bf16.msra.mxu0 %v4821_v60  ;;  %v4843_v60 = vld [vmem:[#allocation2 + $0xe0] ss:$12 sps:$4 sm:$0xff]  }
 0xaae   : > { %4349 = vmatprep.subr.bf16.mxu0 %v4822_v5  ;;  %v4840_v5 = vld [vmem:[#allocation2 + $0xd8] ss:$12 sps:$4 sm:$0xff]  }
 0xab1   : > { %4350 = vmatpush3.bf16.msra.mxu0 %v4823_v6  ;;  %v4846_v6 = vld [vmem:[#allocation2 + $0xf4] ss:$12 sps:$4 sm:$0xff]  }
 0xab2   : > { %4351 = vmatprep.subr.bf16.mxu0 %v4824_v7  ;;  %v4844_v7 = vld [vmem:[#allocation2 + $0xf0] ss:$12 sps:$4 sm:$0xff]  }
 0xab5   : > { %4352 = vmatpush3.bf16.msra.mxu0 %v4825_v8 }
 0xab6   : > { %4353 = vmatprep.subr.bf16.mxu0 %v4826_v9 }
 0xab9   : > { %4354 = vmatpush3.bf16.msra.mxu0 %v4827_v10 }
 0xaba   : > { %4355 = vmatprep.subr.bf16.mxu0 %v4828_v11  ;;  %v4847_v11 = vld [vmem:[#allocation2 + $0xf8] ss:$12 sps:$4 sm:$0xff]  }
 0xabd   : > { %4356 = vmatpush3.bf16.msra.mxu0 %v4829_v12  ;;  %v4850_v12 = vld [vmem:[#allocation2 + $0x10c] ss:$12 sps:$4 sm:$0xff]  }
 0xabe   : > { %4357 = vmatprep.subr.bf16.mxu0 %v4830_v14  ;;  %v4848_v14 = vld [vmem:[#allocation2 + $0x108] ss:$12 sps:$4 sm:$0xff]  }
 0xac1   : > { %4358 = vmatpush3.bf16.msra.mxu0 %v4831_v15  ;;  %v4851_v15 = vld [vmem:[#allocation2 + $0x110] ss:$12 sps:$4 sm:$0xff]  }
 0xac2   : > { %4359 = vmatprep.subr.bf16.mxu0 %v4832_v16  ;;  %v4854_v16 = vld [vmem:[#allocation2 + $0x124] ss:$12 sps:$4 sm:$0xff]  }
 0xac5   : > { %4360 = vmatpush3.bf16.msra.mxu0 %v4833_v17  ;;  %v4852_v17 = vld [vmem:[#allocation2 + $0x120] ss:$12 sps:$4 sm:$0xff]  }
 0xac6   : > { %4361 = vmatprep.subr.bf16.mxu0 %v4834_v18  ;;  %v4855_v18 = vld [vmem:[#allocation2 + $0x128] ss:$12 sps:$4 sm:$0xff]  }
 0xac9   : > { %4362 = vmatpush3.bf16.msra.mxu0 %v4835_v19  ;;  %v4858_v19 = vld [vmem:[#allocation2 + $0x13c] ss:$12 sps:$4 sm:$0xff]  }
 0xaca   : > { %4523 = vmatprep.subr.bf16.mxu0 %v5281_v3 }
 0xb7f   : > { %v1843_v26 = vpop.f32.mrb[8].mxu0 }
 0xb80   : > { %v1844_v27 = vadd.f32 %v4145_v24, %v1843_v26  ;;  %v4521_v28 = vpop.f32.mrb[9].mxu0 }
 0xb81   : > { %v1846_v29 = vpop.f32.mrb[10].mxu0 }
 0xb82   : > { %v4522_v30 = vpop.f32.mrb[11].mxu0  ;;  %v1849_v31 = vadd.f32 %v1844_v27, %v5678_v39  ;;  %v4805_v39 = vld [vmem:[#allocation7 + $0x30] ss:$8 sps:$4 sm:$0xff]  }
 0xb83   : > { %1993 = vmatpush1.bf16.msra.mxu1 %v4805_v39 }
 0xb84   : > { %1852 = vadd.xlane.f32.xlu0 %v1849_v31  ;;  %1994 = vmatprep.subr.bf16.mxu1 %v4810_v47 }
 0xb87   : > { %1995 = vmatpush1.bf16.msra.mxu1 %v4808_v48 }
 0xb88   : > { %1996 = vmatprep.subr.bf16.mxu1 %v4813_v49 }
 0xb8b   : > { %1997 = vmatpush1.bf16.msra.mxu1 %v4811_v50 }
 0xb8c   : > { %1998 = vmatprep.subr.bf16.mxu1 %v4816_v51 }
 0xb8f   : > { %1999 = vmatpush1.bf16.msra.mxu1 %v4814_v52 }
 0xb90   : > { %2000 = vmatprep.subr.bf16.mxu1 %v4819_v53 }
 0xb93   : > { %2001 = vmatpush1.bf16.msra.mxu1 %v4817_v54  ;;  %v4172_v54 = vld [vmem:[%s6073_s13] ss:$0 sm:$0xff] }
 0xc11   : > { %v1853_v37 = vpop.xlane.xlu0 %1852 }
 0xc12   : > { %v1854_v38 = vmul.f32 0.0078125, %v1853_v37 }
 0xc14   : > { %v1855_v40 = vsub.f32 %v1849_v31, %v1854_v38 }
 0xc16   : > { %v1856_v41 = vmul.f32 %v1855_v40, %v1855_v40 }
 0xc18   : > { %1857 = vadd.xlane.f32.xlu1 %v1856_v41 }
 0xca5   : > { %v1858_v55 = vpop.xlane.xlu1 %1857 }
 0xca6   : > { %v1859_v56 = vmul.f32 0.0078125, %v1858_v55 }
 0xca8   : > { %v1860_v57 = vadd.f32 1e-12, %v1859_v56 }
 0xcaa   : > { %4950 = vrsqrt.f32 %v1860_v57 }
 0xcb4   : > { %v4951_v58 = vpop.eup %4950 }
 0xcb5   : > { %v1862_v62 = vmul.f32 %v4951_v58, %v1855_v40 }
 0xcb7   : > { %v1869_v0 = vmul.f32 %v4154_v59, %v1862_v62 }
 0xcb9   : > { %v5813_v1 = vadd.f32 %v4155_v63, %v1869_v0  ;;  %v4836_v63 = vld [vmem:[#allocation2 + $0xc0] ss:$12 sps:$4 sm:$0xff]   ;;  %v4838_v0 = vld [vmem:[#allocation2 + $0xc4] ss:$12 sps:$4 sm:$0xff]  }
 0xcba   : > { %2430 = vmatprep.subr.bf16.mxu1 %v4838_v0 }
 0xcbb   : > { %v1877_v2 = vpack.c.bf16 %v5813_v1, %v5813_v1 }
 0xcbd   : > { %2019 = vmatmul.mubr.bf16.vlgmr.msra.gmra.mrb[20].mxu1 %v1877_v2  ;;  %v4839_v2 = vld [vmem:[#allocation2 + $0xc8] ss:$12 sps:$4 sm:$0xff]  }
 0xcbe   : > { %2462 = vmatprep.mubr.bf16.mxu1 %v5282_v25  ;;  %2431 = vmatpush1.bf16.msra.mxu1 %v4836_v63 }
 0xcbf   : > { %2432 = vmatprep.subr.bf16.mxu1 %v4842_v4 }
 0xcc2   : > { %2433 = vmatpush1.bf16.msra.mxu1 %v4840_v5 }
 0xcc3   : > { %2434 = vmatprep.subr.bf16.mxu1 %v4846_v6 }
 0xcc6   : > { %2435 = vmatpush1.bf16.msra.mxu1 %v4844_v7 }
 0xcc7   : > { %2436 = vmatprep.subr.bf16.mxu1 %v4850_v12 }
 0xcca   : > { %2437 = vmatpush1.bf16.msra.mxu1 %v4848_v14 }
 0xccb   : > { %2438 = vmatprep.subr.bf16.mxu1 %v4854_v16 }
 0xcce   : > { %2439 = vmatpush1.bf16.msra.mxu1 %v4852_v17 }
 0xccf   : > { %2440 = vmatprep.subr.bf16.mxu1 %v4858_v19 }
 0xcd2   : > { %2441 = vmatpush1.bf16.msra.mxu1 %v4856_v20 }
 0xd90   : > { %v2020_v23 = vpop.f32.mrb[20].mxu1 }
 0xd91   : > { %v2021_v24 = vadd.f32 %v2020_v23, %v1899_v21  ;;  %v2022_v26 = vpop.f32.mrb[21].mxu1  ;;  %v4859_v21 = vld [vmem:[#allocation2 + $0x140] ss:$12 sps:$4 sm:$0xff]   ;;  %v4860_v23 = vld [vmem:[#allocation2 + $0x150] ss:$12 sps:$4 sm:$0xff]  }
 0xd92   : > { %v2023_v27 = vadd.f32 %v2022_v26, %v1903_v22  ;;  %v2024_v28 = vpop.f32.mrb[22].mxu1  ;;  %v4862_v22 = vld [vmem:[#allocation2 + $0x154] ss:$12 sps:$4 sm:$0xff]   ;;  %v4866_v26 = vld [vmem:[#allocation2 + $0x16c] ss:$12 sps:$4 sm:$0xff]  }
 0xd93   : > { %v2029_v29 = vmul.f32 0.044715, %v2021_v24  ;;  %v2025_v30 = vpop.f32.mrb[23].mxu1  ;;  %v2027_v44 = vmul.f32 0.5, %v2021_v24  ;;  %2442 = vmatprep.subr.bf16.mxu1 %v4862_v22  ;;  %v4867_v28 = vld [vmem:[#allocation2 + $0x170] ss:$12 sps:$4 sm:$0xff]  }
 0xd94   : > { %v2030_v31 = vmul.f32 0.044715, %v2023_v27  ;;  %v2028_v47 = vmul.f32 0.5, %v2023_v27  ;;  %2443 = vmatpush1.bf16.msra.mxu1 %v4860_v23 }
 0xd95   : > { %v2031_v13 = vmul.f32 %v2029_v29, %v2021_v24  ;;  %2444 = vmatprep.subr.bf16.mxu1 %v4866_v26 }
 0xd96   : > { %v2032_v32 = vmul.f32 %v2030_v31, %v2023_v27 }
 0xd97   : > { %v2033_v33 = vmul.f32 %v2031_v13, %v2021_v24 }
 0xd98   : > { %v2034_v34 = vmul.f32 %v2032_v32, %v2023_v27  ;;  %v4189_v32 = vld [vmem:[#allocation10] ss:$0 sm:$0xff] }
 0xd99   : > { %v2035_v35 = vadd.f32 %v2033_v33, %v2021_v24  ;;  %v4863_v24 = vld [vmem:[#allocation2 + $0x158] ss:$12 sps:$4 sm:$0xff]  }
 0xd9a   : > { %v2036_v36 = vadd.f32 %v2034_v34, %v2023_v27  ;;  %v4864_v27 = vld [vmem:[#allocation2 + $0x168] ss:$12 sps:$4 sm:$0xff]   ;;  %v4190_v34 = vld [vmem:[#allocation12] ss:$0 sm:$0xff] }
 0xd9b   : > { %v2037_v37 = vmul.f32 0.7978846, %v2035_v35  ;;  %2445 = vmatpush1.bf16.msra.mxu1 %v4864_v27 }
 0xd9c   : > { %v2038_v38 = vmul.f32 0.7978846, %v2036_v36  ;;  %4543 = vmatprep.subr.mxu1 %v5281_v3 }
 0xd9d   : > { %4952 = vtanh.f32 %v2037_v37 }
 0xd9e   : > { %4954 = vtanh.f32 %v2038_v38  ;;  %v4191_v38 = vld [vmem:[%s6065_s5 + $0x3] sm:$0x7] }
 0xda7   : > { %v4953_v40 = vpop.eup %4952 }
 0xda8   : > { %v4955_v41 = vpop.eup %4954  ;;  %v2041_v39 = vadd.f32 1.0, %v4953_v40  ;;  %v2294_v40 = vrot.slane %v4191_v38, %v5689_v43 }
 0xda9   : > { %v2042_v48 = vadd.f32 1.0, %v4955_v41 }
 0xdaa   : > { %v2043_v49 = vmul.f32 %v2041_v39, %v2027_v44  ;;  %v2290_v39 = vrot.slane %v4191_v38, %v5695_v45 }
 0xdab   : > { %v2044_v50 = vmul.f32 %v2042_v48, %v2028_v47 }
 0xdac   : > { %v2045_v52 = vpack.c.bf16 %v2043_v49, %v2043_v49  ;;  %v2298_v49 = vrot.slane %v4191_v38, %v848_v46 }
 0xdad   : > { %v2046_v51 = vpack.c.bf16 %v2044_v50, %v2044_v50 }
 0xdaf   : > { %2214 = vmatprep.mubr.bf16.mxu0 %v2046_v51 }
 0xdb0   : > { %2215 = vmatmul.mubr.bf16.vlgmr.msra.gmra.mrb[12].mxu0 %v2045_v52 }
 0xdb1   : > { %4539 = vmatprep.mubr.msk.bf16.mxu0 %vm5283_vm0, %v5281_v3  ;;  %4524 = vmatpush3.bf16.msra.mxu0 %v4839_v2 }
 0xdb2   : > { %4525 = vmatprep.subr.bf16.mxu0 %v5281_v3 }
 0xdb5   : > { %4526 = vmatpush3.bf16.msra.mxu0 %v4843_v60 }
 0xdb6   : > { %4527 = vmatprep.subr.bf16.mxu0 %v5281_v3 }
 0xdb9   : > { %4528 = vmatpush3.bf16.msra.mxu0 %v4847_v11 }
 0xdba   : > { %4529 = vmatprep.subr.bf16.mxu0 %v5281_v3 }
 0xdbd   : > { %4530 = vmatpush3.bf16.msra.mxu0 %v4851_v15 }
 0xdbe   : > { %4531 = vmatprep.subr.bf16.mxu0 %v5281_v3 }
 0xdc1   : > { %4532 = vmatpush3.bf16.msra.mxu0 %v4855_v18 }
 0xdc2   : > { %4533 = vmatprep.subr.bf16.mxu0 %v5281_v3 }
 0xdc5   : > { %4534 = vmatpush3.bf16.msra.mxu0 %v4859_v21 }
 0xdc6   : > { %4535 = vmatprep.subr.bf16.mxu0 %v5281_v3 }
 0xdc9   : > { %4536 = vmatpush3.bf16.msra.mxu0 %v4863_v24 }
 0xdca   : > { %4537 = vmatprep.subr.bf16.mxu0 %v5281_v3 }
 0xdcd   : > { %4538 = vmatpush3.bf16.msra.mxu0 %v4867_v28 }
 0xdce   : > { %4583 = vmatprep.subr.bf16.mxu0 %v5281_v3 }
 0xe83   : > { %v4363_v53 = vpop.f32.mrb[12].mxu0 }
 0xe84   : > { %v4364_v55 = vpop.f32.mrb[13].mxu0 }
 0xe85   : > { %v4365_v56 = vadd.f32 %v4364_v55, %v4363_v53  ;;  %v4366_v57 = vpop.f32.mrb[14].mxu0 }
 0xe86   : > { %v4367_v58 = vpop.f32.mrb[15].mxu0 }
 0xe87   : > { %v2217_v59 = vadd.f32 %v4365_v56, %v4172_v54 }
 0xe89   : > { %v2222_v62 = vadd.f32 %v2217_v59, %v5813_v1 }
 0xe8b   : > { %2225 = vadd.xlane.f32.xlu0 %v2222_v62 }
 0xf18   : > { %v2226_v1 = vpop.xlane.xlu0 %2225 }
 0xf19   : > { %v2227_v8 = vmul.f32 0.0078125, %v2226_v1 }
 0xf1b   : > { %v2228_v9 = vsub.f32 %v2222_v62, %v2227_v8 }
 0xf1d   : > { %v2229_v10 = vmul.f32 %v2228_v9, %v2228_v9 }
 0xf1f   : > { %2230 = vadd.xlane.f32.xlu0 %v2229_v10 }
 0xfac   : > { %v2231_v29 = vpop.xlane.xlu0 %2230 }
 0xfad   : > { %v2232_v30 = vmul.f32 0.0078125, %v2231_v29 }
 0xfaf   : > { %v2233_v31 = vadd.f32 1e-12, %v2232_v30 }
 0xfb1   : > { %4956 = vrsqrt.f32 %v2233_v31 }
 0xfbb   : > { %v4957_v13 = vpop.eup %4956 }
 0xfbc   : > { %v2235_v33 = vmul.f32 %v4957_v13, %v2228_v9 }
 0xfbe   : > { %v2242_v35 = vmul.f32 %v4189_v32, %v2235_v33 }
 0xfc0   : > { %v5839_v36 = vadd.f32 %v4190_v34, %v2242_v35 }
 0xfc2   : > { %v2250_v37 = vpack.c.bf16 %v5839_v36, %v5839_v36 }
 0xfc4   : > { %2463 = vmatmul.mubr.bf16.vlgmr.msra.gmra.mrb[24].mxu1 %v2250_v37  ;;  %4540 = vmatmul.mubr.bf16.vlgmr.msra.gmra.mrb[16].mxu0 %v2250_v37 }
 0xfc5   : > { %4545 = vmatprep.mubr.msk.f32.mxu1 %vm5283_vm0, %v5281_v3  ;;  %4599 = vmatprep.mubr.msk.bf16.mxu0 %vm5283_vm0, %v5281_v3 }
0x1097   : > { %v2464_v41 = vpop.f32.mrb[24].mxu1  ;;  %v2505_v44 = vpop.f32.mrb[16].mxu0 }
0x1098   : > { %v2466_v47 = vpop.f32.mrb[25].mxu1  ;;  %v4541_v48 = vpop.f32.mrb[17].mxu0  ;;  %v5858_v55 = vadd.f32 %v2464_v41, %v2290_v39  ;;  %v5861_v56 = vadd.f32 %v2505_v44, %v2298_v49 }
0x1099   : > { %v5854_v50 = vadd.f32 %v2466_v47, %v2294_v40  ;;  %v2468_v51 = vpop.f32.mrb[26].mxu1  ;;  %v2508_v52 = vpop.f32.mrb[18].mxu0 }
0x109a   : > { %v2469_v53 = vpop.f32.mrb[27].mxu1  ;;  %v4542_v54 = vpop.f32.mrb[19].mxu0 }
0x109b   : > { %4544 = vmatpush3.xpose.msk.msra.mxu1 %vm1062_vm1, %v5854_v50 }
0x109c   : > { %4548 = vmatprep.subr.mxu1 %v5281_v3 }
0x109e   : > { %4546 = vmatmul.mubr.msk.f32.vlgmr.msra.gmra.mrb[18].mxu1 %vm1062_vm1, %v5858_v55 }
0x109f   : > { %4549 = vmatpush3.msra.mxu1 %v5861_v56  ;;  %4550 = vmatprep.mubr.msk.f32.mxu1 %vm5283_vm0, %v5281_v3 }
0x10a0   : > { %4553 = vmatprep.subr.mxu1 %v5281_v3 }
0x1171   : > { %v2583_v42 = vpop.f32.mrb[18].mxu1 }
0x1172   : > { %v2584_v46 = vadd.f32 %v5716_v61, %v2583_v42  ;;  %v4547_v57 = vpop.f32.mrb[19].mxu1 }
0x1174   : > { %v2587_v58 = vsel %vm1139_vm2, %v2584_v46, -inf }
0x1175   : > { %2588 = vmax.xlane.f32.xlu0 %v2587_v58 }
0x118b   : > { %2673 = vrot.lane.b32.xlu0 %v5854_v50, %s5284_s21 }
0x1202   : > { %v2589_v59 = vpop.xlane.xlu0 %2588 }
0x1203   : > { %v2590_v62 = vsub.f32 %v2584_v46, %v2589_v59 }
0x1205   : > { %v2591_v63 = vmul.f32 1.442695, %v2590_v62  ;;  %v4869_v62 = vld [vmem:[%s6066_s6 + $0x48] sm:$0xff]  }
0x1206   : > { %v2674_v6 = vpop.permute.xlu0 %2673 }
0x1207   : > { %4958 = vpow2.f32 %v2591_v63  ;;  %v4870_v63 = vld [vmem:[%s6066_s6 + $0x50] sm:$0xff]  }
0x1211   : > { %v4959_v0 = vpop.eup %4958 }
0x1212   : > { %v2593_v2 = vsel %vm1139_vm2, %v4959_v0, 0.0 }
0x1213   : > { %2594 = vadd.xlane.f32.xlu1 %v2593_v2  ;;  %v4873_v2 = vld [vmem:[%s6066_s6 + $0x68] sm:$0xff]  }
0x1224   : > { %2671 = vrot.lane.b32.xlu1 %v5858_v55, %s5284_s21 }
0x12a0   : > { %v2595_v4 = vpop.xlane.xlu1 %2594 }
0x12a1   : > { %4960 = vrcp.f32 %v2595_v4  ;;  %v4874_v4 = vld [vmem:[%s6066_s6 + $0x70] sm:$0xff]  }
0x12a4   : > { %v2672_v7 = vpop.permute.xlu1 %2671 }
0x12ab   : > { %v4961_v60 = vpop.eup %4960 }
0x12ac   : > { %v2597_v5 = vmul.f32 %v4961_v60, %v4959_v0  ;;  %v4872_v0 = vld [vmem:[%s6066_s6 + $0x60] sm:$0xff]   ;;  %v4875_v60 = vld [vmem:[%s6066_s6 + $0x78] sm:$0xff]  }
0x12ae   : > { %4551 = vmatmul.mubr.msk.f32.vlgmr.msra.gmra.mrb[28].mxu1 %vm1139_vm2, %v2597_v5 }
0x12af   : > { %4554 = vmatpush3.xpose.msk.msra.mxu1 %vm1062_vm1, %v2674_v6  ;;  %4555 = vmatprep.mubr.msk.f32.mxu1 %vm5283_vm0, %v5281_v3 }
0x12b0   : > { %4558 = vmatprep.subr.mxu1 %v5281_v3 }
0x12b2   : > { %4556 = vmatmul.mubr.msk.f32.vlgmr.msra.gmra.mrb[30].mxu1 %vm1062_vm1, %v2672_v7 }
0x12b3   : > { %4560 = vmatprep.mubr.msk.f32.mxu1 %vm5283_vm0, %v5281_v3 }
0x1381   : > { %v5884_v1 = vpop.f32.mrb[28].mxu1 }
0x1382   : > { %v4552_v8 = vpop.f32.mrb[29].mxu1 }
0x1385   : > { %v2745_v9 = vpop.f32.mrb[30].mxu1 }
0x1386   : > { %v2746_v10 = vadd.f32 %v5716_v61, %v2745_v9  ;;  %v4557_v11 = vpop.f32.mrb[31].mxu1 }
0x1388   : > { %v2749_v12 = vsel %vm1139_vm2, %v2746_v10, -inf }
0x1389   : > { %2750 = vmax.xlane.f32.xlu1 %v2749_v12 }
0x139a   : > { %2839 = vrot.lane.b32.xlu1 %v5854_v50, %s5285_s3 }
0x139e   : > { %2837 = vrot.lane.b32.xlu1 %v5858_v55, %s5285_s3 }
0x1416   : > { %v2751_v14 = vpop.xlane.xlu1 %2750 }
0x1417   : > { %v2752_v15 = vsub.f32 %v2746_v10, %v2751_v14 }
0x1419   : > { %v2753_v16 = vmul.f32 1.442695, %v2752_v15  ;;  %v4245_v15 = vld [vmem:[%s6067_s7 + $0x1] ss:$0 sm:$0xff] }
0x141a   : > { %v2840_v22 = vpop.permute.xlu1 %2839 }
0x141b   : > { %4962 = vpow2.f32 %v2753_v16 }
0x141e   : > { %v2838_v24 = vpop.permute.xlu1 %2837 }
0x1425   : > { %v4963_v17 = vpop.eup %4962 }
0x1426   : > { %v2755_v18 = vsel %vm1139_vm2, %v4963_v17, 0.0 }
0x1427   : > { %2756 = vadd.xlane.f32.xlu0 %v2755_v18 }
0x143d   : > { %2761 = vrot.lane.b32.xlu0 %v5861_v56, %s5284_s21 }
0x14b4   : > { %v2757_v19 = vpop.xlane.xlu0 %2756 }
0x14b5   : > { %4964 = vrcp.f32 %v2757_v19 }
0x14b8   : > { %v2762_v20 = vpop.permute.xlu0 %2761 }
0x14b9   : > { %4559 = vmatpush3.msra.mxu1 %v2762_v20 }
0x14ba   : > { %4563 = vmatprep.subr.mxu1 %v5281_v3 }
0x14bf   : > { %v4965_v21 = vpop.eup %4964 }
0x14c0   : > { %v2759_v23 = vmul.f32 %v4965_v21, %v4963_v17 }
0x14c2   : > { %4561 = vmatmul.mubr.msk.f32.vlgmr.msra.gmra.mrb[32].mxu1 %vm1139_vm2, %v2759_v23  ;;  %v4881_v23 = vld [vmem:[#allocation7 + $0x94] ss:$8 sps:$4 sm:$0xff]  }
0x14c3   : > { %4564 = vmatpush3.xpose.msk.msra.mxu1 %vm1062_vm1, %v2840_v22  ;;  %4565 = vmatprep.mubr.msk.f32.mxu1 %vm5283_vm0, %v5281_v3  ;;  %v4878_v22 = vld [vmem:[#allocation7 + $0x84] ss:$8 sps:$4 sm:$0xff]  }
0x14c4   : > { %4568 = vmatprep.subr.mxu1 %v5281_v3 }
0x14c6   : > { %4566 = vmatmul.mubr.msk.f32.vlgmr.msra.gmra.mrb[34].mxu1 %vm1062_vm1, %v2838_v24  ;;  %v4879_v24 = vld [vmem:[#allocation7 + $0x90] ss:$8 sps:$4 sm:$0xff]  }
0x14c7   : > { %4570 = vmatprep.mubr.msk.f32.mxu1 %vm5283_vm0, %v5281_v3 }
0x1595   : > { %v2833_v26 = vpop.f32.mrb[32].mxu1 }
0x1596   : > { %v4562_v27 = vpop.f32.mrb[33].mxu1 }
0x1597   : > { %v4882_v27 = vld [vmem:[#allocation7 + $0xa0] ss:$8 sps:$4 sm:$0xff]  }
0x1599   : > { %v2911_v28 = vpop.f32.mrb[34].mxu1 }
0x159a   : > { %v2912_v29 = vadd.f32 %v5716_v61, %v2911_v28  ;;  %v4567_v30 = vpop.f32.mrb[35].mxu1 }
0x159c   : > { %v2915_v31 = vsel %vm1139_vm2, %v2912_v29, -inf }
0x159d   : > { %2916 = vmax.xlane.f32.xlu1 %v2915_v31 }
0x15ae   : > { %3004 = vrot.lane.b32.xlu1 %v5854_v50, %s5286_s26 }
0x15b2   : > { %3002 = vrot.lane.b32.xlu1 %v5858_v55, %s5286_s26 }
0x162a   : > { %v2917_v13 = vpop.xlane.xlu1 %2916 }
0x162b   : > { %v2918_v32 = vsub.f32 %v2912_v29, %v2917_v13  ;;  %v4887_v13 = vld [vmem:[#allocation7 + $0xb4] ss:$8 sps:$4 sm:$0xff]  }
0x162d   : > { %v2919_v33 = vmul.f32 1.442695, %v2918_v32  ;;  %v4890_v32 = vld [vmem:[#allocation7 + $0xc4] ss:$8 sps:$4 sm:$0xff]  }
0x162e   : > { %v3005_v41 = vpop.permute.xlu1 %3004 }
0x162f   : > { %4966 = vpow2.f32 %v2919_v33  ;;  %v4888_v33 = vld [vmem:[#allocation7 + $0xc0] ss:$8 sps:$4 sm:$0xff]  }
0x1632   : > { %v3003_v39 = vpop.permute.xlu1 %3002 }
0x1639   : > { %v4967_v34 = vpop.eup %4966 }
0x163a   : > { %v2921_v35 = vsel %vm1139_vm2, %v4967_v34, 0.0 }
0x163b   : > { %2922 = vadd.xlane.f32.xlu0 %v2921_v35  ;;  %v4891_v35 = vld [vmem:[#allocation7 + $0xd0] ss:$8 sps:$4 sm:$0xff]  }
0x1651   : > { %2926 = vrot.lane.b32.xlu0 %v5861_v56, %s5285_s3 }
0x16c8   : > { %v2923_v37 = vpop.xlane.xlu0 %2922 }
0x16c9   : > { %4968 = vrcp.f32 %v2923_v37  ;;  %v4896_v37 = vld [vmem:[#allocation7 + $0xe4] ss:$8 sps:$4 sm:$0xff]  }
0x16cc   : > { %v2927_v38 = vpop.permute.xlu0 %2926 }
0x16cd   : > { %4569 = vmatpush3.msra.mxu1 %v2927_v38  ;;  %v4894_v38 = vld [vmem:[#allocation7 + $0xe0] ss:$8 sps:$4 sm:$0xff]  }
0x16ce   : > { %4573 = vmatprep.subr.mxu1 %v5281_v3 }
0x16d3   : > { %v4969_v40 = vpop.eup %4968 }
0x16d4   : > { %v2925_v44 = vmul.f32 %v4969_v40, %v4967_v34  ;;  %v4893_v34 = vld [vmem:[#allocation7 + $0xd4] ss:$8 sps:$4 sm:$0xff]  }
0x16d5   : > { %v4899_v40 = vld [vmem:[#allocation7 + $0xf4] ss:$8 sps:$4 sm:$0xff]  }
0x16d6   : > { %4571 = vmatmul.mubr.msk.f32.vlgmr.msra.gmra.mrb[36].mxu1 %vm1139_vm2, %v2925_v44 }
0x16d7   : > { %4574 = vmatpush3.xpose.msk.msra.mxu1 %vm1062_vm1, %v3005_v41  ;;  %4575 = vmatprep.mubr.msk.f32.mxu1 %vm5283_vm0, %v5281_v3  ;;  %v4897_v41 = vld [vmem:[#allocation7 + $0xf0] ss:$8 sps:$4 sm:$0xff]  }
0x16d8   : > { %4578 = vmatprep.subr.mxu1 %v5281_v3 }
0x16da   : > { %4576 = vmatmul.mubr.msk.f32.vlgmr.msra.gmra.mrb[38].mxu1 %vm1062_vm1, %v3003_v39 }
0x16db   : > { %4580 = vmatprep.mubr.msk.f32.mxu1 %vm5283_vm0, %v5281_v3 }
0x17a9   : > { %v2998_v47 = vpop.f32.mrb[36].mxu1 }
0x17aa   : > { %v4572_v48 = vpop.f32.mrb[37].mxu1 }
0x17ad   : > { %v3076_v49 = vpop.f32.mrb[38].mxu1 }
0x17ae   : > { %v3077_v50 = vadd.f32 %v5716_v61, %v3076_v49  ;;  %v4577_v51 = vpop.f32.mrb[39].mxu1  ;;  %v4254_v49 = vld [vmem:[#allocation4 + $0x1] ss:$0 sm:$0xff] }
0x17af   : > { %v4255_v51 = vld [vmem:[#allocation6 + $0x1] ss:$0 sm:$0xff] }
0x17b0   : > { %v3080_v52 = vsel %vm1139_vm2, %v3077_v50, -inf }
0x17b1   : > { %3081 = vmax.xlane.f32.xlu0 %v3080_v52 }
0x17c7   : > { %3091 = vrot.lane.b32.xlu0 %v5861_v56, %s5286_s26  ;;  %v4868_v56 = vld [vmem:[%s6066_s6 + $0x40] sm:$0xff]  }
0x17c8   : > { %4584 = vmatpush3.bf16.msra.mxu0 %v4868_v56  ;;  %v4907_v56 = vld [vmem:[#allocation9 + $0x98] sm:$0xff]  }
0x17c9   : > { %4585 = vmatprep.subr.bf16.mxu0 %v5281_v3 }
0x17cb   : > { %3172 = vrot.lane.b32.xlu0 %v2998_v47, %s5285_s3 }
0x17cc   : > { %4586 = vmatpush3.bf16.msra.mxu0 %v4869_v62  ;;  %v4908_v62 = vld [vmem:[#allocation9 + $0xe0] sm:$0xff]  }
0x17cd   : > { %4587 = vmatprep.subr.bf16.mxu0 %v5281_v3 }
0x17d0   : > { %4588 = vmatpush3.bf16.msra.mxu0 %v4870_v63  ;;  %v4909_v63 = vld [vmem:[#allocation9 + $0xa0] sm:$0xff]  }
0x17d1   : > { %4589 = vmatprep.subr.bf16.mxu0 %v5281_v3 }
0x183e   : > { %v3082_v53 = vpop.xlane.xlu0 %3081 }
0x183f   : > { %v3083_v54 = vsub.f32 %v3077_v50, %v3082_v53 }
0x1841   : > { %v3084_v55 = vmul.f32 1.442695, %v3083_v54 }
0x1842   : > { %v3092_v42 = vpop.permute.xlu0 %3091 }
0x1843   : > { %4970 = vpow2.f32 %v3084_v55  ;;  %4579 = vmatpush3.msra.mxu1 %v3092_v42  ;;  %v4900_v55 = vld [vmem:[#allocation9 + $0xc0] sm:$0xff]  }
0x1844   : > { %3437 = vmatprep.subr.bf16.mxu1 %v4878_v22  ;;  %v4901_v42 = vld [vmem:[#allocation9 + $0x80] sm:$0xff]  }
0x1846   : > { %v3173_v9 = vpop.permute.xlu0 %3172 }
0x184d   : > { %v4971_v46 = vpop.eup %4970 }
0x184e   : > { %v3086_v57 = vsel %vm1139_vm2, %v4971_v46, 0.0 }
0x184f   : > { %3087 = vadd.xlane.f32.xlu1 %v3086_v57  ;;  %v4903_v57 = vld [vmem:[#allocation9 + $0x88] sm:$0xff]  }
0x1860   : > { %3168 = vrot.lane.b32.xlu1 %v2833_v26, %s5286_s26  ;;  %v4884_v26 = vld [vmem:[#allocation7 + $0xa4] ss:$8 sps:$4 sm:$0xff]  }
0x18dc   : > { %v3088_v61 = vpop.xlane.xlu1 %3087 }
0x18dd   : > { %4972 = vrcp.f32 %v3088_v61  ;;  %v4904_v61 = vld [vmem:[#allocation9 + $0xd0] sm:$0xff]  }
0x18e0   : > { %v3169_v7 = vpop.permute.xlu1 %3168 }
0x18e1   : > { %v3179_v8 = vsel %vm1062_vm1, %v5884_v1, %v3169_v7  ;;  %v4876_v1 = vld [vmem:[#allocation7 + $0x80] ss:$8 sps:$4 sm:$0xff]  }
0x18e2   : > { %v3180_v10 = vsel %vm1733_vm3, %v3179_v8, %v3173_v9 }
0x18e7   : > { %v4973_v58 = vpop.eup %4972 }
0x18e8   : > { %v3090_v59 = vmul.f32 %v4973_v58, %v4971_v46  ;;  %v4902_v46 = vld [vmem:[#allocation9 + $0xc8] sm:$0xff]   ;;  %v4905_v58 = vld [vmem:[#allocation9 + $0x90] sm:$0xff]  }
0x18ea   : > { %4581 = vmatmul.mubr.msk.f32.vlgmr.msra.gmra.mrb[40].mxu1 %vm1139_vm2, %v3090_v59  ;;  %v4906_v59 = vld [vmem:[#allocation9 + $0xd8] sm:$0xff]  }
0x18eb   : > { %3469 = vmatprep.mubr.bf16.mxu1 %v5282_v25  ;;  %v4871_v25 = vld [vmem:[%s6066_s6 + $0x58] sm:$0xff]   ;;  %3438 = vmatpush1.bf16.msra.mxu1 %v4876_v1 }
0x18ec   : > { %4590 = vmatpush3.bf16.msra.mxu0 %v4871_v25  ;;  %3439 = vmatprep.subr.bf16.mxu1 %v4881_v23  ;;  %v4910_v25 = vld [vmem:[#allocation9 + $0xe8] sm:$0xff]  }
0x18ed   : > { %4591 = vmatprep.subr.bf16.mxu0 %v5281_v3 }
0x18ef   : > { %3440 = vmatpush1.bf16.msra.mxu1 %v4879_v24 }
0x18f0   : > { %4592 = vmatpush3.bf16.msra.mxu0 %v4872_v0  ;;  %3441 = vmatprep.subr.bf16.mxu1 %v4884_v26  ;;  %v4911_v0 = vld [vmem:[#allocation9 + $0xa8] sm:$0xff]  }
0x18f1   : > { %4593 = vmatprep.subr.bf16.mxu0 %v5281_v3 }
0x18f3   : > { %3442 = vmatpush1.bf16.msra.mxu1 %v4882_v27 }
0x18f4   : > { %4594 = vmatpush3.bf16.msra.mxu0 %v4873_v2  ;;  %3443 = vmatprep.subr.bf16.mxu1 %v4887_v13  ;;  %v4912_v2 = vld [vmem:[#allocation9 + $0xf0] sm:$0xff]  }
0x18f5   : > { %4595 = vmatprep.subr.bf16.mxu0 %v5281_v3 }
0x18f8   : > { %4596 = vmatpush3.bf16.msra.mxu0 %v4874_v4  ;;  %v4913_v4 = vld [vmem:[#allocation9 + $0xb0] sm:$0xff]  }
0x18f9   : > { %4597 = vmatprep.subr.bf16.mxu0 %v5281_v3 }
0x18fc   : > { %4598 = vmatpush3.bf16.msra.mxu0 %v4875_v60  ;;  %v4914_v60 = vld [vmem:[#allocation9 + $0xf8] sm:$0xff]  }
0x18fd   : > { %4403 = vmatprep.subr.bf16.mxu0 %v4900_v55  ;;  %v4922_v55 = vld [vmem:[%s6127_s20 + $0x30] sm:$0xff]  }
0x19bd   : > { %v3163_v5 = vpop.f32.mrb[40].mxu1 }
0x19be   : > { %3176 = vrot.lane.b32.xlu1 %v3163_v5, %s5284_s21  ;;  %v4582_v6 = vpop.f32.mrb[41].mxu1  ;;  %v4915_v5 = vld [vmem:[#allocation9 + $0xb8] sm:$0xff]  }
0x19bf   : > { %v4256_v6 = vld [vmem:[%s6071_s11 + $0x2] sm:$0x3] }
0x19c0   : > { %v3350_v7 = vrot.slane %v4256_v6, %v5695_v45  ;;  %v3354_v8 = vrot.slane %v4256_v6, %v5689_v43  ;;  %v4928_v6 = vld [vmem:[%s6128_s29 + $0x20] sm:$0xff]  }
0x1a30   : > { %v3177_v11 = vpop.permute.xlu1 %3176 }
0x1a31   : > { %v3181_v12 = vsel %vm1735_vm4, %v3180_v10, %v3177_v11 }
0x1a32   : > { %v3182_v14 = vpack.c.bf16 %v3181_v12, %v3181_v12 }
0x1a34   : > { %4600 = vmatmul.mubr.bf16.vlgmr.msra.gmra.mrb[20].mxu0 %v3182_v14 }
0x1a35   : > { %4404 = vmatpush3.bf16.msra.mxu0 %v4901_v42  ;;  %v4923_v42 = vld [vmem:[%s6127_s20 + $0x38] sm:$0xff]  }
0x1a36   : > { %4405 = vmatprep.subr.bf16.mxu0 %v4902_v46  ;;  %v4924_v46 = vld [vmem:[%s6128_s29] sm:$0xff]  }
0x1a39   : > { %4406 = vmatpush3.bf16.msra.mxu0 %v4903_v57  ;;  %v4925_v57 = vld [vmem:[%s6128_s29 + $0x8] sm:$0xff]  }
0x1a3a   : > { %4407 = vmatprep.subr.bf16.mxu0 %v4904_v61  ;;  %v4926_v61 = vld [vmem:[%s6128_s29 + $0x10] sm:$0xff]  }
0x1a3d   : > { %4408 = vmatpush3.bf16.msra.mxu0 %v4905_v58  ;;  %v4927_v58 = vld [vmem:[%s6128_s29 + $0x18] sm:$0xff]  }
0x1a3e   : > { %4409 = vmatprep.subr.bf16.mxu0 %v4906_v59 }
0x1a41   : > { %4410 = vmatpush3.bf16.msra.mxu0 %v4907_v56 }
0x1a42   : > { %4411 = vmatprep.subr.bf16.mxu0 %v4908_v62 }
0x1a45   : > { %4412 = vmatpush3.bf16.msra.mxu0 %v4909_v63 }
0x1a46   : > { %4413 = vmatprep.subr.bf16.mxu0 %v4910_v25  ;;  %v4291_v25 = vld [vmem:[#allocation10 + $0x1] ss:$0 sm:$0xff] }
0x1a49   : > { %4414 = vmatpush3.bf16.msra.mxu0 %v4911_v0 }
0x1a4a   : > { %4415 = vmatprep.subr.bf16.mxu0 %v4912_v2  ;;  %v4292_v2 = vld [vmem:[#allocation12 + $0x1] ss:$0 sm:$0xff] }
0x1a4d   : > { %4416 = vmatpush3.bf16.msra.mxu0 %v4913_v4 }
0x1a4e   : > { %4417 = vmatprep.subr.bf16.mxu0 %v4914_v60 }
0x1a51   : > { %4418 = vmatpush3.bf16.msra.mxu0 %v4915_v5 }
0x1a52   : > { %4623 = vmatprep.subr.bf16.mxu0 %v5281_v3 }
0x1b07   : > { %v3290_v16 = vpop.f32.mrb[20].mxu0 }
0x1b08   : > { %v3291_v17 = vadd.f32 %v4245_v15, %v3290_v16  ;;  %v4601_v18 = vpop.f32.mrb[21].mxu0 }
0x1b09   : > { %v3293_v19 = vpop.f32.mrb[22].mxu0 }
0x1b0a   : > { %v4602_v20 = vpop.f32.mrb[23].mxu0  ;;  %v3296_v21 = vadd.f32 %v3291_v17, %v5839_v36  ;;  %v4885_v36 = vld [vmem:[#allocation7 + $0xb0] ss:$8 sps:$4 sm:$0xff]  }
0x1b0b   : > { %3444 = vmatpush1.bf16.msra.mxu1 %v4885_v36 }
0x1b0c   : > { %3301 = vadd.xlane.f32.xlu0 %v3296_v21  ;;  %3445 = vmatprep.subr.bf16.mxu1 %v4890_v32 }
0x1b0f   : > { %3446 = vmatpush1.bf16.msra.mxu1 %v4888_v33  ;;  %v4274_v33 = vld [vmem:[%s6073_s13 + $0x1] ss:$0 sm:$0xff] }
0x1b10   : > { %3447 = vmatprep.subr.bf16.mxu1 %v4893_v34 }
0x1b13   : > { %3448 = vmatpush1.bf16.msra.mxu1 %v4891_v35 }
0x1b14   : > { %3449 = vmatprep.subr.bf16.mxu1 %v4896_v37 }
0x1b17   : > { %3450 = vmatpush1.bf16.msra.mxu1 %v4894_v38 }
0x1b18   : > { %3451 = vmatprep.subr.bf16.mxu1 %v4899_v40 }
0x1b1b   : > { %3452 = vmatpush1.bf16.msra.mxu1 %v4897_v41 }
0x1b1c   : > { %4603 = vmatprep.subr.bf16.mxu1 %v5281_v3 }
0x1b99   : > { %v3302_v28 = vpop.xlane.xlu0 %3301 }
0x1b9a   : > { %v3303_v29 = vmul.f32 0.0078125, %v3302_v28 }
0x1b9c   : > { %v3304_v30 = vsub.f32 %v3296_v21, %v3303_v29 }
0x1b9e   : > { %v3305_v31 = vmul.f32 %v3304_v30, %v3304_v30 }
0x1ba0   : > { %3306 = vadd.xlane.f32.xlu1 %v3305_v31 }
0x1c2d   : > { %v3307_v44 = vpop.xlane.xlu1 %3306 }
0x1c2e   : > { %v3308_v39 = vmul.f32 0.0078125, %v3307_v44  ;;  %v4916_v44 = vld [vmem:[%s6127_s20] sm:$0xff]  }
0x1c30   : > { %v3309_v47 = vadd.f32 1e-12, %v3308_v39  ;;  %v4917_v39 = vld [vmem:[%s6127_s20 + $0x8] sm:$0xff]  }
0x1c32   : > { %4974 = vrsqrt.f32 %v3309_v47 }
0x1c3c   : > { %v4975_v48 = vpop.eup %4974 }
0x1c3d   : > { %v3311_v50 = vmul.f32 %v4975_v48, %v3304_v30 }
0x1c3f   : > { %v3318_v52 = vmul.f32 %v4254_v49, %v3311_v50 }
0x1c41   : > { %v5972_v53 = vadd.f32 %v4255_v51, %v3318_v52  ;;  %v4918_v51 = vld [vmem:[%s6127_s20 + $0x10] sm:$0xff]   ;;  %v4919_v52 = vld [vmem:[%s6127_s20 + $0x18] sm:$0xff]  }
0x1c43   : > { %v3326_v54 = vpack.c.bf16 %v5972_v53, %v5972_v53 }
0x1c45   : > { %3470 = vmatmul.mubr.bf16.vlgmr.msra.gmra.mrb[44].mxu1 %v3326_v54  ;;  %v4921_v54 = vld [vmem:[%s6127_s20 + $0x28] sm:$0xff]  }
0x1c46   : > { %4619 = vmatprep.mubr.msk.bf16.mxu1 %vm5283_vm0, %v5281_v3  ;;  %4604 = vmatpush3.bf16.msra.mxu1 %v4916_v44 }
0x1c47   : > { %4605 = vmatprep.subr.bf16.mxu1 %v5281_v3 }
0x1c4a   : > { %4606 = vmatpush3.bf16.msra.mxu1 %v4917_v39 }
0x1c4b   : > { %4607 = vmatprep.subr.bf16.mxu1 %v5281_v3 }
0x1c4e   : > { %4608 = vmatpush3.bf16.msra.mxu1 %v4918_v51 }
0x1c4f   : > { %4609 = vmatprep.subr.bf16.mxu1 %v5281_v3 }
0x1c52   : > { %4610 = vmatpush3.bf16.msra.mxu1 %v4919_v52 }
0x1c53   : > { %4611 = vmatprep.subr.bf16.mxu1 %v5281_v3 }
0x1d18   : > { %v3471_v9 = vpop.f32.mrb[44].mxu1 }
0x1d19   : > { %v3472_v10 = vadd.f32 %v3471_v9, %v3350_v7  ;;  %v3473_v11 = vpop.f32.mrb[45].mxu1  ;;  %v4929_v7 = vld [vmem:[%s6128_s29 + $0x28] sm:$0xff]   ;;  %v4931_v9 = vld [vmem:[%s6128_s29 + $0x38] sm:$0xff]  }
0x1d1a   : > { %v3474_v12 = vadd.f32 %v3473_v11, %v3354_v8  ;;  %v3475_v14 = vpop.f32.mrb[46].mxu1  ;;  %v4930_v8 = vld [vmem:[%s6128_s29 + $0x30] sm:$0xff]  }
0x1d1b   : > { %v3480_v15 = vmul.f32 0.044715, %v3472_v10  ;;  %v3476_v16 = vpop.f32.mrb[47].mxu1  ;;  %v3478_v26 = vmul.f32 0.5, %v3472_v10 }
0x1d1c   : > { %v3481_v17 = vmul.f32 0.044715, %v3474_v12  ;;  %v3479_v28 = vmul.f32 0.5, %v3474_v12 }
0x1d1d   : > { %v3482_v18 = vmul.f32 %v3480_v15, %v3472_v10 }
0x1d1e   : > { %v3483_v19 = vmul.f32 %v3481_v17, %v3474_v12 }
0x1d1f   : > { %v3484_v20 = vmul.f32 %v3482_v18, %v3472_v10 }
0x1d20   : > { %v3485_v21 = vmul.f32 %v3483_v19, %v3474_v12  ;;  %v4302_v19 = vld [vmem:[#allocation15] ss:$0 sm:$0xff] }
0x1d21   : > { %v3486_v1 = vadd.f32 %v3484_v20, %v3472_v10  ;;  %v4293_v10 = vld [vmem:[#allocation13] ss:$0 sm:$0xff] }
0x1d22   : > { %v3487_v22 = vadd.f32 %v3485_v21, %v3474_v12 }
0x1d23   : > { %v3488_v23 = vmul.f32 0.7978846, %v3486_v1 }
0x1d24   : > { %v3489_v24 = vmul.f32 0.7978846, %v3487_v22 }
0x1d25   : > { %4976 = vtanh.f32 %v3488_v23 }
0x1d26   : > { %4978 = vtanh.f32 %v3489_v24 }
0x1d2f   : > { %v4977_v45 = vpop.eup %4976 }
0x1d30   : > { %v4979_v43 = vpop.eup %4978  ;;  %v3492_v27 = vadd.f32 1.0, %v4977_v45 }
0x1d31   : > { %v3493_v29 = vadd.f32 1.0, %v4979_v43 }
0x1d32   : > { %v3494_v30 = vmul.f32 %v3492_v27, %v3478_v26 }
0x1d33   : > { %v3495_v31 = vmul.f32 %v3493_v29, %v3479_v28 }
0x1d34   : > { %v3496_v36 = vpack.c.bf16 %v3494_v30, %v3494_v30 }
0x1d35   : > { %v3497_v13 = vpack.c.bf16 %v3495_v31, %v3495_v31 }
0x1d37   : > { %3667 = vmatprep.mubr.bf16.mxu0 %v3497_v13 }
0x1d38   : > { %3668 = vmatmul.mubr.bf16.vlgmr.msra.gmra.mrb[24].mxu0 %v3496_v36 }
0x1d39   : > { %4639 = vmatprep.mubr.msk.bf16.mxu0 %vm5283_vm0, %v5281_v3  ;;  %4624 = vmatpush3.bf16.msra.mxu0 %v4924_v46 }
0x1d3a   : > { %4625 = vmatprep.subr.bf16.mxu0 %v5281_v3 }
0x1d3d   : > { %4626 = vmatpush3.bf16.msra.mxu0 %v4925_v57 }
0x1d3e   : > { %4627 = vmatprep.subr.bf16.mxu0 %v5281_v3 }
0x1d41   : > { %4628 = vmatpush3.bf16.msra.mxu0 %v4926_v61 }
0x1d42   : > { %4629 = vmatprep.subr.bf16.mxu0 %v5281_v3 }
0x1d45   : > { %4630 = vmatpush3.bf16.msra.mxu0 %v4927_v58 }
0x1d46   : > { %4631 = vmatprep.subr.bf16.mxu0 %v5281_v3 }
0x1d49   : > { %4632 = vmatpush3.bf16.msra.mxu0 %v4928_v6 }
0x1d4a   : > { %4633 = vmatprep.subr.bf16.mxu0 %v5281_v3 }
0x1d4d   : > { %4634 = vmatpush3.bf16.msra.mxu0 %v4929_v7 }
0x1d4e   : > { %4635 = vmatprep.subr.bf16.mxu0 %v5281_v3 }
0x1d51   : > { %4636 = vmatpush3.bf16.msra.mxu0 %v4930_v8 }
0x1d52   : > { %4637 = vmatprep.subr.bf16.mxu0 %v5281_v3 }
0x1d55   : > { %4638 = vmatpush3.bf16.msra.mxu0 %v4931_v9 }
0x1e0b   : > { %v4419_v32 = vpop.f32.mrb[24].mxu0 }
0x1e0c   : > { %v4420_v34 = vpop.f32.mrb[25].mxu0 }
0x1e0d   : > { %v4421_v35 = vadd.f32 %v4420_v34, %v4419_v32  ;;  %v4422_v37 = vpop.f32.mrb[26].mxu0 }
0x1e0e   : > { %v4423_v38 = vpop.f32.mrb[27].mxu0 }
0x1e0f   : > { %v3670_v40 = vadd.f32 %v4421_v35, %v4274_v33 }
0x1e11   : > { %v3675_v41 = vadd.f32 %v3670_v40, %v5972_v53  ;;  %v4920_v53 = vld [vmem:[%s6127_s20 + $0x20] sm:$0xff]  }
0x1e12   : > { %4612 = vmatpush3.bf16.msra.mxu1 %v4920_v53 }
0x1e13   : > { %3680 = vadd.xlane.f32.xlu0 %v3675_v41  ;;  %4613 = vmatprep.subr.bf16.mxu1 %v5281_v3 }
0x1e16   : > { %4614 = vmatpush3.bf16.msra.mxu1 %v4921_v54 }
0x1e17   : > { %4615 = vmatprep.subr.bf16.mxu1 %v5281_v3 }
0x1e1a   : > { %4616 = vmatpush3.bf16.msra.mxu1 %v4922_v55 }
0x1e1b   : > { %4617 = vmatprep.subr.bf16.mxu1 %v5281_v3 }
0x1e1e   : > { %4618 = vmatpush3.bf16.msra.mxu1 %v4923_v42 }
0x1ea0   : > { %v3681_v47 = vpop.xlane.xlu0 %3680 }
0x1ea1   : > { %v3682_v48 = vmul.f32 0.0078125, %v3681_v47 }
0x1ea3   : > { %v3683_v49 = vsub.f32 %v3675_v41, %v3682_v48 }
0x1ea5   : > { %v3684_v50 = vmul.f32 %v3683_v49, %v3683_v49 }
0x1ea7   : > { %3685 = vadd.xlane.f32.xlu0 %v3684_v50 }
0x1f34   : > { %v3686_v59 = vpop.xlane.xlu0 %3685 }
0x1f35   : > { %v3687_v56 = vmul.f32 0.0078125, %v3686_v59 }
0x1f37   : > { %v3688_v62 = vadd.f32 1e-12, %v3687_v56 }
0x1f39   : > { %4980 = vrsqrt.f32 %v3688_v62 }
0x1f43   : > { %v4981_v63 = vpop.eup %4980 }
0x1f44   : > { %v3690_v0 = vmul.f32 %v4981_v63, %v3683_v49 }
0x1f46   : > { %v3697_v4 = vmul.f32 %v4291_v25, %v3690_v0 }
0x1f48   : > { %v3704_v60 = vadd.f32 %v4292_v2, %v3697_v4 }
0x1f4a   : > { %v3705_v5 = vpack.c.bf16 %v3704_v60, %v3704_v60 }
0x1f4c   : > { %4620 = vmatmul.mubr.bf16.vlgmr.msra.gmra.mrb[48].mxu1 %v3705_v5 }
0x201f   : > { %v3811_v11 = vpop.f32.mrb[48].mxu1 }
0x2020   : > { %v3812_v12 = vadd.f32 %v4293_v10, %v3811_v11  ;;  %v4621_v14 = vpop.f32.mrb[49].mxu1 }
0x2021   : > { %v3814_v15 = vpop.f32.mrb[50].mxu1 }
0x2022   : > { %4982 = vtanh.f32 %v3812_v12  ;;  %v4622_v16 = vpop.f32.mrb[51].mxu1 }
0x202c   : > { %v4983_v17 = vpop.eup %4982 }
0x202d   : > { %v3818_v18 = vpack.c.bf16 %v4983_v17, %v4983_v17 }
0x202f   : > { %4640 = vmatmul.mubr.bf16.vlgmr.msra.gmra.mrb[28].mxu0 %v3818_v18 }
0x2102   : > { %v3924_v3 = vpop.f32.mrb[28].mxu0 }
0x2103   : > { %v3925_v20 = vadd.f32 %v4302_v19, %v3924_v3  ;;  %v4641_v21 = vpop.f32.mrb[29].mxu0 }
0x2104   : > { %v3927_v1 = vpop.f32.mrb[30].mxu0 }
0x2105   : > { %3930 = vst [vmem:[%s765_s22] sm:$0xff] %v3925_v20  ;;  %v4642_v22 = vpop.f32.mrb[31].mxu0 }
0x2106 PF: > { %s6130_s1 = sld [smem:[#allocation21_spill]] }
0x210c   : > { %s35_s1 = sadd.s32 1, %s6130_s1  }
0x210d   : > { %p32_p9 = scmp.ge.s32.totalorder %s35_s1, 4  }
0x210f   :  { %34 = sbr.rel (!%p32_p9) target bundleno = 17 (0x11), region = 182 }
0x2116   :  { %3950 = vsyncpa [#allocation3], 1 }
0x2117   :  { %3952 = vsyncpa [#allocation3 + $0x1], 1 }
0x2118   :  { %3953 = vsyncpa [#allocation5], 1 }
0x2119   :  { %3954 = vsyncpa [#allocation8], 1 }
0x211a   :  { %3955 = vsyncpa [#allocation11], 1 }
0x211b   :  { %3956 = vsyncpa [#allocation14], 1 }

</bundles_post_ra>
